<compile_context>
chip_gen: v6e
topology: v6e:2x2x1
jax: 0.10.0
libtpu: 0.0.40
codegen_flags: <defaults>
</compile_context>

<pallas_src>
import functools
import math

import jax
import jax.numpy as jnp
import numpy as np
from jax.experimental import pallas as pl
from jax.experimental.pallas import tpu as pltpu

NODE_ALIGN = 16          # node-dim padding (sublane-friendly for bf16 and f32)
_VMEM_BUDGET = 24 << 20  # conservative per-call budget used by the tb heuristic


def _round_up(x, m):
    return ((x + m - 1) // m) * m


def _pick_tb(b, n_pad, row_bytes, vmem_budget=_VMEM_BUDGET):
    """Batch fold: fill the MXU M dim, but keep >= 2 batch grid steps when B >= 2
    (v7x megacore sharding + DMA double-buffering across batch steps)."""
    cap = 1 if b < 2 else b // 2
    best = 1
    for cand in range(1, cap + 1):
        if b % cand == 0 and 2 * cand * n_pad * max(row_bytes, 1) <= vmem_budget:
            best = cand
    return best


# --------------------------------------------------------------------------------------
# Fused "GC chain" kernel: 1..L GraphConvolutions (+ folded BN affine + LeakyReLU),
# first layer consumes multiple dense-concat segments, optional residual at the end.
# --------------------------------------------------------------------------------------
def _gc_epilogue(acc, att, scale, shift, apply_act, tb, n_pad):
    """out = att @ acc (per batch), then BN affine (+folded GC bias) and LeakyReLU."""
    f = acc.shape[-1]
    lhs = acc.astype(att.dtype)
    if tb == 1:
        out = jnp.dot(att, lhs, preferred_element_type=jnp.float32)
        out = out * scale + shift
    else:
        lhs3 = lhs.reshape(tb, n_pad, f)
        att_b = jnp.broadcast_to(att, (tb, n_pad, n_pad))
        out = jnp.einsum("bnm,bmf->bnf", att_b, lhs3,
                         preferred_element_type=jnp.float32)
        out = out * scale[None] + shift[None]
        out = out.reshape(tb * n_pad, f)
    if apply_act:
        out = jnp.where(out > 0, out, 0.01 * out)     # LeakyReLU(0.01)
    return out


def _gcn_chain_kernel(*refs, nseg, nlayers, acts, tb, n_pad, has_residual):
    idx = 0
    seg_refs = refs[idx:idx + nseg]; idx += nseg

    layer_refs = []
    # layer 0: one weight ref per input segment (dense-packed K, no padding)
    w0 = refs[idx:idx + nseg]; idx += nseg
    layer_refs.append((w0, refs[idx], refs[idx + 1], refs[idx + 2])); idx += 3
    # later layers consume the previous layer's (VMEM-resident) output: single W
    for _ in range(1, nlayers):
        layer_refs.append(((refs[idx],), refs[idx + 1], refs[idx + 2], refs[idx + 3]))
        idx += 4

    resid_ref = None
    if has_residual:
        resid_ref = refs[idx]; idx += 1
    o_ref = refs[idx]

    # ---- layer 0: support = sum_j x_seg_j @ W_seg_j, f32 accumulation on the MXU ----
    w_refs, att_ref, sc_ref, sh_ref = layer_refs[0]
    acc = jnp.dot(seg_refs[0][...], w_refs[0][...], preferred_element_type=jnp.float32)
    for j in range(1, nseg):
        acc = acc + jnp.dot(seg_refs[j][...], w_refs[j][...],
                            preferred_element_type=jnp.float32)
    cur = _gc_epilogue(acc, att_ref[...], sc_ref[...], sh_ref[...], acts[0], tb, n_pad)

    # ---- later layers: intermediate activations never leave VMEM ----
    for l in range(1, nlayers):
        w_refs, att_ref, sc_ref, sh_ref = layer_refs[l]
        w = w_refs[0][...]
        acc = jnp.dot(cur.astype(w.dtype), w, preferred_element_type=jnp.float32)
        cur = _gc_epilogue(acc, att_ref[...], sc_ref[...], sh_ref[...], acts[l], tb, n_pad)

    if resid_ref is not None:
        cur = cur + resid_ref[...].astype(jnp.float32)
    o_ref[...] = cur.astype(o_ref.dtype)


def _gcn_chain(segs, layers, acts, *, n_pad, residual=None, out_dtype=None):
    """Run a fused chain of GraphConvolutions.

    segs:   list of 2-D activation segments, each (B*n_pad, width_j)
    layers: list of prepared layer dicts (w_segs tuple, att, scale, shift)
            layer 0's w_segs matches `segs`; later layers have a single W.
    acts:   tuple of bools (apply LeakyReLU per layer)
    residual: optional (B*n_pad, f_out) f32 added after the last layer.
    """
    rows = segs[0].shape[0]
    assert rows % n_pad == 0
    b = rows // n_pad
    nseg, nlayers = len(segs), len(layers)
    f_out = layers[-1]["scale"].shape[1]
    out_dtype = segs[0].dtype if out_dtype is None else out_dtype

    seg_row_bytes = sum(s.shape[1] * s.dtype.itemsize for s in segs)
    res_item = residual.dtype.itemsize if residual is not None else 0
    row_bytes = seg_row_bytes + f_out * (jnp.dtype(out_dtype).itemsize + res_item)
    tb = _pick_tb(b, n_pad, row_bytes)
    m = tb * n_pad

    in_specs, inputs, need = [], [], 0

    def _add(arr, spec_shape, index_map):
        nonlocal need
        in_specs.append(pl.BlockSpec(spec_shape, index_map))
        inputs.append(arr)
        need += 2 * int(np.prod(spec_shape)) * arr.dtype.itemsize  # double-buffered

    for s in segs:                                          # batch-tiled activations
        _add(s, (m, s.shape[1]), lambda i: (i, 0))
    for li, lay in enumerate(layers):
        wl = lay["w_segs"]
        assert len(wl) == (nseg if li == 0 else 1)
        for wseg in wl:                                     # resident weights
            _add(wseg, wseg.shape, lambda i: (0, 0))
        for nm in ("att", "scale", "shift"):                # resident epilogue params
            arr = lay[nm]
            _add(arr, arr.shape, lambda i: (0, 0))
    if residual is not None:
        _add(residual, (m, f_out), lambda i: (i, 0))

    out_spec = pl.BlockSpec((m, f_out), lambda i: (i, 0))
    need += 2 * m * f_out * jnp.dtype(out_dtype).itemsize
    f_max = max([f_out] + [s.shape[1] for s in segs] + [l["scale"].shape[1] for l in layers])
    need += 8 * m * f_max * 4                               # in-kernel f32 temporaries
    vmem_limit = int(min(64 << 20, max(int(need * 1.5) + (1 << 20), 16 << 20)))

    kernel = functools.partial(_gcn_chain_kernel, nseg=nseg, nlayers=nlayers,
                               acts=tuple(acts), tb=tb, n_pad=n_pad,
                               has_residual=residual is not None)

    return pl.pallas_call(
        kernel,
        out_shape=jax.ShapeDtypeStruct((rows, f_out), out_dtype),
        grid_spec=pltpu.PrefetchScalarGridSpec(
            num_scalar_prefetch=0,
            grid=(b // tb,),
            in_specs=in_specs,
            out_specs=out_spec,
        ),
        compiler_params=pltpu.CompilerParams(
            dimension_semantics=("parallel",),
            vmem_limit_bytes=vmem_limit),
    )(*inputs)


# --------------------------------------------------------------------------------------
# Parameter setup (matches the PyTorch module's layers used in forward)
# --------------------------------------------------------------------------------------
def _gc_params(key, in_f, out_f, node_n):
    k1, k2, k3 = jax.random.split(key, 3)
    stdv = 1.0 / math.sqrt(out_f)
    return {
        "w": jax.random.uniform(k1, (in_f, out_f), jnp.float32, -stdv, stdv),
        "att": jax.random.uniform(k2, (node_n, node_n), jnp.float32, -stdv, stdv),
        "b": jax.random.uniform(k3, (out_f,), jnp.float32, -stdv, stdv),
    }


def _bn_params(key, num_features):
    k1, k2, k3, k4 = jax.random.split(key, 4)
    return {
        "gamma": jax.random.uniform(k1, (num_features,), jnp.float32, 0.5, 1.5),
        "beta": jax.random.normal(k2, (num_features,), jnp.float32) * 0.1,
        "mean": jax.random.normal(k3, (num_features,), jnp.float32) * 0.1,
        "var": jax.random.uniform(k4, (num_features,), jnp.float32, 0.5, 1.5),
    }


def init_dense_gcn_params(key, input_feature, hidden_feature, num_stage, node_n,
                          middle_feature=100):
    params = {}
    key, k = jax.random.split(key)
    params["gc1"] = _gc_params(k, input_feature, hidden_feature, node_n)
    key, k = jax.random.split(key)
    params["bn1"] = _bn_params(k, node_n * hidden_feature)
    blocks = []
    for i in range(num_stage):
        in_f = i * middle_feature + hidden_feature
        blk = {}
        key, k = jax.random.split(key)
        blk["gc1"] = _gc_params(k, in_f, in_f, node_n)
        key, k = jax.random.split(key)
        blk["bn1"] = _bn_params(k, node_n * in_f)
        key, k = jax.random.split(key)
        blk["gc2"] = _gc_params(k, in_f, middle_feature, node_n)
        key, k = jax.random.split(key)
        blk["bn2"] = _bn_params(k, node_n * middle_feature)
        blocks.append(blk)
    params["blocks"] = blocks
    key, k = jax.random.split(key)
    params["gc7"] = _gc_params(k, middle_feature * num_stage + hidden_feature,
                               input_feature, node_n)
    return params


# --------------------------------------------------------------------------------------
# One-time parameter preparation (OUTSIDE the jitted forward): BN fold, bias fold,
# W row-splitting per dense-concat segment, node padding, dtype casts.
# --------------------------------------------------------------------------------------
def _prep_gc_layer(gc, bn, seg_widths, node_n, n_pad, compute_dtype, eps=1e-5):
    in_f, out_f = gc["w"].shape
    assert sum(seg_widths) == in_f
    if bn is not None:
        inv_std = 1.0 / jnp.sqrt(bn["var"] + eps)
        scale = (bn["gamma"] * inv_std).reshape(node_n, out_f)
        shift = (bn["beta"] - bn["mean"] * bn["gamma"] * inv_std).reshape(node_n, out_f)
    else:
        scale = jnp.ones((node_n, out_f), jnp.float32)
        shift = jnp.zeros((node_n, out_f), jnp.float32)
    shift = shift + gc["b"][None, :] * scale              # fold GC bias into the shift
    pad_n = n_pad - node_n

    w = gc["w"].astype(compute_dtype)
    w_segs, off = [], 0
    for wd in seg_widths:                                  # dense packing: exact widths
        w_segs.append(w[off:off + wd]); off += wd

    return {
        "w_segs": tuple(w_segs),
        "att": jnp.pad(gc["att"], ((0, pad_n), (0, pad_n))).astype(compute_dtype),
        "scale": jnp.pad(scale, ((0, pad_n), (0, 0))).astype(jnp.float32),
        "shift": jnp.pad(shift, ((0, pad_n), (0, 0))).astype(jnp.float32),
    }


def prepare_dense_gcn(params, *, node_n, num_stage, hidden_feature, input_feature,
                      middle_feature=100, compute_dtype=jnp.bfloat16):
    n_pad = _round_up(node_n, NODE_ALIGN)
    prep = {
        "gc1": _prep_gc_layer(params["gc1"], params["bn1"], (input_feature,),
                              node_n, n_pad, compute_dtype),
        "blocks": [],
    }
    for i, blk in enumerate(params["blocks"]):
        seg_w = (hidden_feature,) + (middle_feature,) * i
        l1 = _prep_gc_layer(blk["gc1"], blk["bn1"], seg_w, node_n, n_pad, compute_dtype)
        l2 = _prep_gc_layer(blk["gc2"], blk["bn2"], (sum(seg_w),),
                            node_n, n_pad, compute_dtype)
        prep["blocks"].append((l1, l2))
    prep["gc7"] = _prep_gc_layer(params["gc7"], None,
                                 (hidden_feature,) + (middle_feature,) * num_stage,
                                 node_n, n_pad, compute_dtype)
    return prep


# --------------------------------------------------------------------------------------
# Dense_GCN forward (Pallas) and pure-JAX reference
# --------------------------------------------------------------------------------------
def dense_gcn_forward_pallas(x, prep, *, node_n, input_feature):
    n_pad = _round_up(node_n, NODE_ALIGN)
    B = x.shape[0]
    xp = x if n_pad == node_n else jnp.pad(x, ((0, 0), (0, n_pad - node_n), (0, 0)))
    x2 = xp.reshape(B * n_pad, input_feature)        # 2-D slab: no in-kernel reshapes
    cdtype = prep["gc1"]["att"].dtype                # stream dtype chosen at prep time

    # gc1 -> bn1 -> LeakyReLU (dropout = identity in eval)
    segs = [_gcn_chain([x2.astype(cdtype)], [prep["gc1"]], (True,), n_pad=n_pad)]

    # GC_Block_NoRes stages: gc1+bn1+act+gc2+bn2+act fused in ONE kernel per stage;
    # the dense "concat" is just the growing list of segments (never materialized).
    for (l1, l2) in prep["blocks"]:
        segs.append(_gcn_chain(list(segs), [l1, l2], (True, True), n_pad=n_pad))

    # gc7 (no BN, no activation) with the "+ x" residual fused into the epilogue
    out2 = _gcn_chain(list(segs), [prep["gc7"]], (False,), n_pad=n_pad,
                      residual=x2.astype(jnp.float32), out_dtype=jnp.float32)

    out = out2.reshape(B, n_pad, input_feature)
    return out if n_pad == node_n else out[:, :node_n, :]


def dense_gcn_forward_ref(x, params, eps=1e-5):
    """Pure-jnp eval-mode reference mirroring the PyTorch module."""
    def gc(y, p):
        support = jnp.einsum("bnk,kf->bnf", y, p["w"])
        return jnp.einsum("nm,bmf->bnf", p["att"], support) + p["b"]

    def bn(y, p):
        b, n, f = y.shape
        yf = y.reshape(b, n * f)
        yf = (yf - p["mean"]) / jnp.sqrt(p["var"] + eps) * p["gamma"] + p["beta"]
        return yf.reshape(b, n, f)

    def act(y):
        return jnp.where(y > 0, y, 0.01 * y)

    y = act(bn(gc(x, params["gc1"]), params["bn1"]))
    for blk in params["blocks"]:
        t = act(bn(gc(y, blk["gc1"]), blk["bn1"]))
        y1 = act(bn(gc(t, blk["gc2"]), blk["bn2"]))
        y = jnp.concatenate([y, y1], axis=2)
    return gc(y, params["gc7"]) + x


# --------------------------------------------------------------------------------------
if __name__ == "__main__":
    key = jax.random.PRNGKey(0)
    B, node_n = 2, 48
    input_feature, hidden_feature, num_stage = 16, 32, 2

    kp, kx = jax.random.split(key)
    params = init_dense_gcn_params(kp, input_feature, hidden_feature, num_stage, node_n)
    x = jax.random.normal(kx, (B, node_n, input_feature), jnp.float32)

    ref = dense_gcn_forward_ref(x, params)

    fwd = jax.jit(functools.partial(dense_gcn_forward_pallas,
                                    node_n=node_n, input_feature=input_feature))

    # 1) f32 streams: validates the fused kernel math at the original tight tolerance.
    prep_f32 = prepare_dense_gcn(params, node_n=node_n, num_stage=num_stage,
                                 hidden_feature=hidden_feature,
                                 input_feature=input_feature,
                                 compute_dtype=jnp.float32)
    out_f32 = jax.block_until_ready(fwd(x, prep_f32))
    np.testing.assert_allclose(np.asarray(out_f32), np.asarray(ref),
                               rtol=2e-3, atol=2e-3)

    # 2) bf16 streams (default fast path): half the HBM bytes, f32 MXU accumulation.
    prep_bf16 = prepare_dense_gcn(params, node_n=node_n, num_stage=num_stage,
                                  hidden_feature=hidden_feature,
                                  input_feature=input_feature,
                                  compute_dtype=jnp.bfloat16)
    out_bf16 = jax.block_until_ready(fwd(x, prep_bf16))
    np.testing.assert_allclose(np.asarray(out_bf16), np.asarray(ref),
                               rtol=5e-2, atol=5e-2)

    print("KERNEL_OK")
</pallas_src>

<mosaic_0001>
module attributes {stable_mosaic.version = 11 : i64} {
  func.func @_gcn_chain_kernel(%arg0: i32, %arg1: memref<48x32xf32, #tpu.memory_space<vmem>>, %arg2: memref<32x32xf32, #tpu.memory_space<vmem>>, %arg3: memref<48x48xf32, #tpu.memory_space<vmem>>, %arg4: memref<48x32xf32, #tpu.memory_space<vmem>>, %arg5: memref<48x32xf32, #tpu.memory_space<vmem>>, %arg6: memref<32x100xf32, #tpu.memory_space<vmem>>, %arg7: memref<48x48xf32, #tpu.memory_space<vmem>>, %arg8: memref<48x100xf32, #tpu.memory_space<vmem>>, %arg9: memref<48x100xf32, #tpu.memory_space<vmem>>, %arg10: memref<48x100xf32, #tpu.memory_space<vmem>>) attributes {dimension_semantics = [#tpu.dimension_semantics<parallel>], iteration_bounds = array<i64: 2>, scalar_prefetch = 0 : i64, scratch_operands = 0 : i64, tpu.core_type = #tpu.core_type<tc>, window_params = [{transform_indices = @transform_0, window_bounds = array<i64: 48, 32>}, {pipeline_mode = #tpu.pipeline_mode<synchronous>, transform_indices = @transform_1, window_bounds = array<i64: 32, 32>}, {pipeline_mode = #tpu.pipeline_mode<synchronous>, transform_indices = @transform_2, window_bounds = array<i64: 48, 48>}, {pipeline_mode = #tpu.pipeline_mode<synchronous>, transform_indices = @transform_3, window_bounds = array<i64: 48, 32>}, {pipeline_mode = #tpu.pipeline_mode<synchronous>, transform_indices = @transform_4, window_bounds = array<i64: 48, 32>}, {pipeline_mode = #tpu.pipeline_mode<synchronous>, transform_indices = @transform_5, window_bounds = array<i64: 32, 100>}, {pipeline_mode = #tpu.pipeline_mode<synchronous>, transform_indices = @transform_6, window_bounds = array<i64: 48, 48>}, {pipeline_mode = #tpu.pipeline_mode<synchronous>, transform_indices = @transform_7, window_bounds = array<i64: 48, 100>}, {pipeline_mode = #tpu.pipeline_mode<synchronous>, transform_indices = @transform_8, window_bounds = array<i64: 48, 100>}, {transform_indices = @transform_9, window_bounds = array<i64: 48, 100>}]} {
    %c0 = arith.constant 0 : index
    %c0_0 = arith.constant 0 : index
    %0 = vector.load %arg1[%c0, %c0_0] : memref<48x32xf32, #tpu.memory_space<vmem>>, vector<48x32xf32>
    %c0_1 = arith.constant 0 : index
    %c0_2 = arith.constant 0 : index
    %1 = vector.load %arg2[%c0_1, %c0_2] : memref<32x32xf32, #tpu.memory_space<vmem>>, vector<32x32xf32>
    %cst = arith.constant dense<0.000000e+00> : vector<48x32xf32>
    %2 = tpu.matmul %0, %1, %cst {dimension_numbers = #tpu.dot_dimension_numbers<[1], [0], [0], [1], [0, 0, 1, 1], [], []>} : vector<48x32xf32>, vector<32x32xf32>, vector<48x32xf32> -> vector<48x32xf32>
    %c0_3 = arith.constant 0 : index
    %c0_4 = arith.constant 0 : index
    %3 = vector.load %arg3[%c0_3, %c0_4] : memref<48x48xf32, #tpu.memory_space<vmem>>, vector<48x48xf32>
    %c0_5 = arith.constant 0 : index
    %c0_6 = arith.constant 0 : index
    %4 = vector.load %arg4[%c0_5, %c0_6] : memref<48x32xf32, #tpu.memory_space<vmem>>, vector<48x32xf32>
    %c0_7 = arith.constant 0 : index
    %c0_8 = arith.constant 0 : index
    %5 = vector.load %arg5[%c0_7, %c0_8] : memref<48x32xf32, #tpu.memory_space<vmem>>, vector<48x32xf32>
    %cst_9 = arith.constant dense<0.000000e+00> : vector<48x32xf32>
    %6 = tpu.matmul %3, %2, %cst_9 {dimension_numbers = #tpu.dot_dimension_numbers<[1], [0], [0], [1], [0, 0, 1, 1], [], []>} : vector<48x48xf32>, vector<48x32xf32>, vector<48x32xf32> -> vector<48x32xf32>
    %7 = arith.mulf %6, %4 : vector<48x32xf32>
    %8 = arith.addf %7, %5 : vector<48x32xf32>
    %cst_10 = arith.constant 0.000000e+00 : f32
    %9 = vector.broadcast %cst_10 : f32 to vector<48x32xf32>
    %10 = arith.cmpf ogt, %8, %9 : vector<48x32xf32>
    %cst_11 = arith.constant 0.00999999977 : f32
    %11 = vector.broadcast %cst_11 : f32 to vector<48x32xf32>
    %12 = arith.mulf %11, %8 : vector<48x32xf32>
    %13 = arith.select %10, %8, %12 : vector<48x32xi1>, vector<48x32xf32>
    %c0_12 = arith.constant 0 : index
    %c0_13 = arith.constant 0 : index
    %14 = vector.load %arg6[%c0_12, %c0_13] : memref<32x100xf32, #tpu.memory_space<vmem>>, vector<32x100xf32>
    %cst_14 = arith.constant dense<0.000000e+00> : vector<48x100xf32>
    %15 = tpu.matmul %13, %14, %cst_14 {dimension_numbers = #tpu.dot_dimension_numbers<[1], [0], [0], [1], [0, 0, 1, 1], [], []>} : vector<48x32xf32>, vector<32x100xf32>, vector<48x100xf32> -> vector<48x100xf32>
    %c0_15 = arith.constant 0 : index
    %c0_16 = arith.constant 0 : index
    %16 = vector.load %arg7[%c0_15, %c0_16] : memref<48x48xf32, #tpu.memory_space<vmem>>, vector<48x48xf32>
    %c0_17 = arith.constant 0 : index
    %c0_18 = arith.constant 0 : index
    %17 = vector.load %arg8[%c0_17, %c0_18] : memref<48x100xf32, #tpu.memory_space<vmem>>, vector<48x100xf32>
    %c0_19 = arith.constant 0 : index
    %c0_20 = arith.constant 0 : index
    %18 = vector.load %arg9[%c0_19, %c0_20] : memref<48x100xf32, #tpu.memory_space<vmem>>, vector<48x100xf32>
    %cst_21 = arith.constant dense<0.000000e+00> : vector<48x100xf32>
    %19 = tpu.matmul %16, %15, %cst_21 {dimension_numbers = #tpu.dot_dimension_numbers<[1], [0], [0], [1], [0, 0, 1, 1], [], []>} : vector<48x48xf32>, vector<48x100xf32>, vector<48x100xf32> -> vector<48x100xf32>
    %20 = arith.mulf %19, %17 : vector<48x100xf32>
    %21 = arith.addf %20, %18 : vector<48x100xf32>
    %cst_22 = arith.constant 0.000000e+00 : f32
    %22 = vector.broadcast %cst_22 : f32 to vector<48x100xf32>
    %23 = arith.cmpf ogt, %21, %22 : vector<48x100xf32>
    %cst_23 = arith.constant 0.00999999977 : f32
    %24 = vector.broadcast %cst_23 : f32 to vector<48x100xf32>
    %25 = arith.mulf %24, %21 : vector<48x100xf32>
    %26 = arith.select %23, %21, %25 : vector<48x100xi1>, vector<48x100xf32>
    %c0_24 = arith.constant 0 : index
    %c0_25 = arith.constant 0 : index
    %27 = vector.load %arg10[%c0_24, %c0_25] : memref<48x100xf32, #tpu.memory_space<vmem>>, vector<48x100xf32>
    tpu.vector_store %arg10[%c0_24, %c0_25], %26 {strides = array<i32>} : memref<48x100xf32, #tpu.memory_space<vmem>>, vector<48x100xf32>,
    return
  }
  func.func @transform_0(%arg0: i32) -> (i32, i32) {
    %c0_i32 = arith.constant 0 : i32
    %c0_i32_0 = arith.constant 0 : i32
    return %arg0, %c0_i32 : i32, i32
  }
  func.func @transform_1(%arg0: i32) -> (i32, i32) {
    %c0_i32 = arith.constant 0 : i32
    %c0_i32_0 = arith.constant 0 : i32
    %c0_i32_1 = arith.constant 0 : i32
    return %c0_i32, %c0_i32_0 : i32, i32
  }
  func.func @transform_2(%arg0: i32) -> (i32, i32) {
    %c0_i32 = arith.constant 0 : i32
    %c0_i32_0 = arith.constant 0 : i32
    %c0_i32_1 = arith.constant 0 : i32
    return %c0_i32, %c0_i32_0 : i32, i32
  }
  func.func @transform_3(%arg0: i32) -> (i32, i32) {
    %c0_i32 = arith.constant 0 : i32
    %c0_i32_0 = arith.constant 0 : i32
    %c0_i32_1 = arith.constant 0 : i32
    return %c0_i32, %c0_i32_0 : i32, i32
  }
  func.func @transform_4(%arg0: i32) -> (i32, i32) {
    %c0_i32 = arith.constant 0 : i32
    %c0_i32_0 = arith.constant 0 : i32
    %c0_i32_1 = arith.constant 0 : i32
    return %c0_i32, %c0_i32_0 : i32, i32
  }
  func.func @transform_5(%arg0: i32) -> (i32, i32) {
    %c0_i32 = arith.constant 0 : i32
    %c0_i32_0 = arith.constant 0 : i32
    %c0_i32_1 = arith.constant 0 : i32
    return %c0_i32, %c0_i32_0 : i32, i32
  }
  func.func @transform_6(%arg0: i32) -> (i32, i32) {
    %c0_i32 = arith.constant 0 : i32
    %c0_i32_0 = arith.constant 0 : i32
    %c0_i32_1 = arith.constant 0 : i32
    return %c0_i32, %c0_i32_0 : i32, i32
  }
  func.func @transform_7(%arg0: i32) -> (i32, i32) {
    %c0_i32 = arith.constant 0 : i32
    %c0_i32_0 = arith.constant 0 : i32
    %c0_i32_1 = arith.constant 0 : i32
    return %c0_i32, %c0_i32_0 : i32, i32
  }
  func.func @transform_8(%arg0: i32) -> (i32, i32) {
    %c0_i32 = arith.constant 0 : i32
    %c0_i32_0 = arith.constant 0 : i32
    %c0_i32_1 = arith.constant 0 : i32
    return %c0_i32, %c0_i32_0 : i32, i32
  }
  func.func @transform_9(%arg0: i32) -> (i32, i32) {
    %c0_i32 = arith.constant 0 : i32
    %c0_i32_0 = arith.constant 0 : i32
    return %arg0, %c0_i32 : i32, i32
  }
}

module attributes {stable_mosaic.version = 11 : i64} {
  func.func @_gcn_chain_kernel(%arg0: i32, %arg1: memref<48x16xf32, #tpu.memory_space<vmem>>, %arg2: memref<16x32xf32, #tpu.memory_space<vmem>>, %arg3: memref<48x48xf32, #tpu.memory_space<vmem>>, %arg4: memref<48x32xf32, #tpu.memory_space<vmem>>, %arg5: memref<48x32xf32, #tpu.memory_space<vmem>>, %arg6: memref<48x32xf32, #tpu.memory_space<vmem>>) attributes {dimension_semantics = [#tpu.dimension_semantics<parallel>], iteration_bounds = array<i64: 2>, scalar_prefetch = 0 : i64, scratch_operands = 0 : i64, tpu.core_type = #tpu.core_type<tc>, window_params = [{transform_indices = @transform_0, window_bounds = array<i64: 48, 16>}, {pipeline_mode = #tpu.pipeline_mode<synchronous>, transform_indices = @transform_1, window_bounds = array<i64: 16, 32>}, {pipeline_mode = #tpu.pipeline_mode<synchronous>, transform_indices = @transform_2, window_bounds = array<i64: 48, 48>}, {pipeline_mode = #tpu.pipeline_mode<synchronous>, transform_indices = @transform_3, window_bounds = array<i64: 48, 32>}, {pipeline_mode = #tpu.pipeline_mode<synchronous>, transform_indices = @transform_4, window_bounds = array<i64: 48, 32>}, {transform_indices = @transform_5, window_bounds = array<i64: 48, 32>}]} {
    %c0 = arith.constant 0 : index
    %c0_0 = arith.constant 0 : index
    %0 = vector.load %arg1[%c0, %c0_0] : memref<48x16xf32, #tpu.memory_space<vmem>>, vector<48x16xf32>
    %c0_1 = arith.constant 0 : index
    %c0_2 = arith.constant 0 : index
    %1 = vector.load %arg2[%c0_1, %c0_2] : memref<16x32xf32, #tpu.memory_space<vmem>>, vector<16x32xf32>
    %cst = arith.constant dense<0.000000e+00> : vector<48x32xf32>
    %2 = tpu.matmul %0, %1, %cst {dimension_numbers = #tpu.dot_dimension_numbers<[1], [0], [0], [1], [0, 0, 1, 1], [], []>} : vector<48x16xf32>, vector<16x32xf32>, vector<48x32xf32> -> vector<48x32xf32>
    %c0_3 = arith.constant 0 : index
    %c0_4 = arith.constant 0 : index
    %3 = vector.load %arg3[%c0_3, %c0_4] : memref<48x48xf32, #tpu.memory_space<vmem>>, vector<48x48xf32>
    %c0_5 = arith.constant 0 : index
    %c0_6 = arith.constant 0 : index
    %4 = vector.load %arg4[%c0_5, %c0_6] : memref<48x32xf32, #tpu.memory_space<vmem>>, vector<48x32xf32>
    %c0_7 = arith.constant 0 : index
    %c0_8 = arith.constant 0 : index
    %5 = vector.load %arg5[%c0_7, %c0_8] : memref<48x32xf32, #tpu.memory_space<vmem>>, vector<48x32xf32>
    %cst_9 = arith.constant dense<0.000000e+00> : vector<48x32xf32>
    %6 = tpu.matmul %3, %2, %cst_9 {dimension_numbers = #tpu.dot_dimension_numbers<[1], [0], [0], [1], [0, 0, 1, 1], [], []>} : vector<48x48xf32>, vector<48x32xf32>, vector<48x32xf32> -> vector<48x32xf32>
    %7 = arith.mulf %6, %4 : vector<48x32xf32>
    %8 = arith.addf %7, %5 : vector<48x32xf32>
    %cst_10 = arith.constant 0.000000e+00 : f32
    %9 = vector.broadcast %cst_10 : f32 to vector<48x32xf32>
    %10 = arith.cmpf ogt, %8, %9 : vector<48x32xf32>
    %cst_11 = arith.constant 0.00999999977 : f32
    %11 = vector.broadcast %cst_11 : f32 to vector<48x32xf32>
    %12 = arith.mulf %11, %8 : vector<48x32xf32>
    %13 = arith.select %10, %8, %12 : vector<48x32xi1>, vector<48x32xf32>
    %c0_12 = arith.constant 0 : index
    %c0_13 = arith.constant 0 : index
    %14 = vector.load %arg6[%c0_12, %c0_13] : memref<48x32xf32, #tpu.memory_space<vmem>>, vector<48x32xf32>
    tpu.vector_store %arg6[%c0_12, %c0_13], %13 {strides = array<i32>} : memref<48x32xf32, #tpu.memory_space<vmem>>, vector<48x32xf32>,
    return
  }
  func.func @transform_0(%arg0: i32) -> (i32, i32) {
    %c0_i32 = arith.constant 0 : i32
    %c0_i32_0 = arith.constant 0 : i32
    return %arg0, %c0_i32 : i32, i32
  }
  func.func @transform_1(%arg0: i32) -> (i32, i32) {
    %c0_i32 = arith.constant 0 : i32
    %c0_i32_0 = arith.constant 0 : i32
    %c0_i32_1 = arith.constant 0 : i32
    return %c0_i32, %c0_i32_0 : i32, i32
  }
  func.func @transform_2(%arg0: i32) -> (i32, i32) {
    %c0_i32 = arith.constant 0 : i32
    %c0_i32_0 = arith.constant 0 : i32
    %c0_i32_1 = arith.constant 0 : i32
    return %c0_i32, %c0_i32_0 : i32, i32
  }
  func.func @transform_3(%arg0: i32) -> (i32, i32) {
    %c0_i32 = arith.constant 0 : i32
    %c0_i32_0 = arith.constant 0 : i32
    %c0_i32_1 = arith.constant 0 : i32
    return %c0_i32, %c0_i32_0 : i32, i32
  }
  func.func @transform_4(%arg0: i32) -> (i32, i32) {
    %c0_i32 = arith.constant 0 : i32
    %c0_i32_0 = arith.constant 0 : i32
    %c0_i32_1 = arith.constant 0 : i32
    return %c0_i32, %c0_i32_0 : i32, i32
  }
  func.func @transform_5(%arg0: i32) -> (i32, i32) {
    %c0_i32 = arith.constant 0 : i32
    %c0_i32_0 = arith.constant 0 : i32
    return %arg0, %c0_i32 : i32, i32
  }
}

module attributes {stable_mosaic.version = 11 : i64} {
  func.func @_gcn_chain_kernel(%arg0: i32, %arg1: memref<48x32xf32, #tpu.memory_space<vmem>>, %arg2: memref<48x100xf32, #tpu.memory_space<vmem>>, %arg3: memref<32x132xf32, #tpu.memory_space<vmem>>, %arg4: memref<100x132xf32, #tpu.memory_space<vmem>>, %arg5: memref<48x48xf32, #tpu.memory_space<vmem>>, %arg6: memref<48x132xf32, #tpu.memory_space<vmem>>, %arg7: memref<48x132xf32, #tpu.memory_space<vmem>>, %arg8: memref<132x100xf32, #tpu.memory_space<vmem>>, %arg9: memref<48x48xf32, #tpu.memory_space<vmem>>, %arg10: memref<48x100xf32, #tpu.memory_space<vmem>>, %arg11: memref<48x100xf32, #tpu.memory_space<vmem>>, %arg12: memref<48x100xf32, #tpu.memory_space<vmem>>) attributes {dimension_semantics = [#tpu.dimension_semantics<parallel>], iteration_bounds = array<i64: 2>, scalar_prefetch = 0 : i64, scratch_operands = 0 : i64, tpu.core_type = #tpu.core_type<tc>, window_params = [{transform_indices = @transform_0, window_bounds = array<i64: 48, 32>}, {transform_indices = @transform_1, window_bounds = array<i64: 48, 100>}, {pipeline_mode = #tpu.pipeline_mode<synchronous>, transform_indices = @transform_2, window_bounds = array<i64: 32, 132>}, {pipeline_mode = #tpu.pipeline_mode<synchronous>, transform_indices = @transform_3, window_bounds = array<i64: 100, 132>}, {pipeline_mode = #tpu.pipeline_mode<synchronous>, transform_indices = @transform_4, window_bounds = array<i64: 48, 48>}, {pipeline_mode = #tpu.pipeline_mode<synchronous>, transform_indices = @transform_5, window_bounds = array<i64: 48, 132>}, {pipeline_mode = #tpu.pipeline_mode<synchronous>, transform_indices = @transform_6, window_bounds = array<i64: 48, 132>}, {pipeline_mode = #tpu.pipeline_mode<synchronous>, transform_indices = @transform_7, window_bounds = array<i64: 132, 100>}, {pipeline_mode = #tpu.pipeline_mode<synchronous>, transform_indices = @transform_8, window_bounds = array<i64: 48, 48>}, {pipeline_mode = #tpu.pipeline_mode<synchronous>, transform_indices = @transform_9, window_bounds = array<i64: 48, 100>}, {pipeline_mode = #tpu.pipeline_mode<synchronous>, transform_indices = @transform_10, window_bounds = array<i64: 48, 100>}, {transform_indices = @transform_11, window_bounds = array<i64: 48, 100>}]} {
    %c0 = arith.constant 0 : index
    %c0_0 = arith.constant 0 : index
    %0 = vector.load %arg1[%c0, %c0_0] : memref<48x32xf32, #tpu.memory_space<vmem>>, vector<48x32xf32>
    %c0_1 = arith.constant 0 : index
    %c0_2 = arith.constant 0 : index
    %1 = vector.load %arg3[%c0_1, %c0_2] : memref<32x132xf32, #tpu.memory_space<vmem>>, vector<32x132xf32>
    %cst = arith.constant dense<0.000000e+00> : vector<48x132xf32>
    %2 = tpu.matmul %0, %1, %cst {dimension_numbers = #tpu.dot_dimension_numbers<[1], [0], [0], [1], [0, 0, 1, 1], [], []>} : vector<48x32xf32>, vector<32x132xf32>, vector<48x132xf32> -> vector<48x132xf32>
    %c0_3 = arith.constant 0 : index
    %c0_4 = arith.constant 0 : index
    %3 = vector.load %arg2[%c0_3, %c0_4] : memref<48x100xf32, #tpu.memory_space<vmem>>, vector<48x100xf32>
    %c0_5 = arith.constant 0 : index
    %c0_6 = arith.constant 0 : index
    %4 = vector.load %arg4[%c0_5, %c0_6] : memref<100x132xf32, #tpu.memory_space<vmem>>, vector<100x132xf32>
    %cst_7 = arith.constant dense<0.000000e+00> : vector<48x132xf32>
    %5 = tpu.matmul %3, %4, %cst_7 {dimension_numbers = #tpu.dot_dimension_numbers<[1], [0], [0], [1], [0, 0, 1, 1], [], []>} : vector<48x100xf32>, vector<100x132xf32>, vector<48x132xf32> -> vector<48x132xf32>
    %6 = arith.addf %2, %5 : vector<48x132xf32>
    %c0_8 = arith.constant 0 : index
    %c0_9 = arith.constant 0 : index
    %7 = vector.load %arg5[%c0_8, %c0_9] : memref<48x48xf32, #tpu.memory_space<vmem>>, vector<48x48xf32>
    %c0_10 = arith.constant 0 : index
    %c0_11 = arith.constant 0 : index
    %8 = vector.load %arg6[%c0_10, %c0_11] : memref<48x132xf32, #tpu.memory_space<vmem>>, vector<48x132xf32>
    %c0_12 = arith.constant 0 : index
    %c0_13 = arith.constant 0 : index
    %9 = vector.load %arg7[%c0_12, %c0_13] : memref<48x132xf32, #tpu.memory_space<vmem>>, vector<48x132xf32>
    %cst_14 = arith.constant dense<0.000000e+00> : vector<48x132xf32>
    %10 = tpu.matmul %7, %6, %cst_14 {dimension_numbers = #tpu.dot_dimension_numbers<[1], [0], [0], [1], [0, 0, 1, 1], [], []>} : vector<48x48xf32>, vector<48x132xf32>, vector<48x132xf32> -> vector<48x132xf32>
    %11 = arith.mulf %10, %8 : vector<48x132xf32>
    %12 = arith.addf %11, %9 : vector<48x132xf32>
    %cst_15 = arith.constant 0.000000e+00 : f32
    %13 = vector.broadcast %cst_15 : f32 to vector<48x132xf32>
    %14 = arith.cmpf ogt, %12, %13 : vector<48x132xf32>
    %cst_16 = arith.constant 0.00999999977 : f32
    %15 = vector.broadcast %cst_16 : f32 to vector<48x132xf32>
    %16 = arith.mulf %15, %12 : vector<48x132xf32>
    %17 = arith.select %14, %12, %16 : vector<48x132xi1>, vector<48x132xf32>
    %c0_17 = arith.constant 0 : index
    %c0_18 = arith.constant 0 : index
    %18 = vector.load %arg8[%c0_17, %c0_18] : memref<132x100xf32, #tpu.memory_space<vmem>>, vector<132x100xf32>
    %cst_19 = arith.constant dense<0.000000e+00> : vector<48x100xf32>
    %19 = tpu.matmul %17, %18, %cst_19 {dimension_numbers = #tpu.dot_dimension_numbers<[1], [0], [0], [1], [0, 0, 1, 1], [], []>} : vector<48x132xf32>, vector<132x100xf32>, vector<48x100xf32> -> vector<48x100xf32>
    %c0_20 = arith.constant 0 : index
    %c0_21 = arith.constant 0 : index
    %20 = vector.load %arg9[%c0_20, %c0_21] : memref<48x48xf32, #tpu.memory_space<vmem>>, vector<48x48xf32>
    %c0_22 = arith.constant 0 : index
    %c0_23 = arith.constant 0 : index
    %21 = vector.load %arg10[%c0_22, %c0_23] : memref<48x100xf32, #tpu.memory_space<vmem>>, vector<48x100xf32>
    %c0_24 = arith.constant 0 : index
    %c0_25 = arith.constant 0 : index
    %22 = vector.load %arg11[%c0_24, %c0_25] : memref<48x100xf32, #tpu.memory_space<vmem>>, vector<48x100xf32>
    %cst_26 = arith.constant dense<0.000000e+00> : vector<48x100xf32>
    %23 = tpu.matmul %20, %19, %cst_26 {dimension_numbers = #tpu.dot_dimension_numbers<[1], [0], [0], [1], [0, 0, 1, 1], [], []>} : vector<48x48xf32>, vector<48x100xf32>, vector<48x100xf32> -> vector<48x100xf32>
    %24 = arith.mulf %23, %21 : vector<48x100xf32>
    %25 = arith.addf %24, %22 : vector<48x100xf32>
    %cst_27 = arith.constant 0.000000e+00 : f32
    %26 = vector.broadcast %cst_27 : f32 to vector<48x100xf32>
    %27 = arith.cmpf ogt, %25, %26 : vector<48x100xf32>
    %cst_28 = arith.constant 0.00999999977 : f32
    %28 = vector.broadcast %cst_28 : f32 to vector<48x100xf32>
    %29 = arith.mulf %28, %25 : vector<48x100xf32>
    %30 = arith.select %27, %25, %29 : vector<48x100xi1>, vector<48x100xf32>
    %c0_29 = arith.constant 0 : index
    %c0_30 = arith.constant 0 : index
    %31 = vector.load %arg12[%c0_29, %c0_30] : memref<48x100xf32, #tpu.memory_space<vmem>>, vector<48x100xf32>
    tpu.vector_store %arg12[%c0_29, %c0_30], %30 {strides = array<i32>} : memref<48x100xf32, #tpu.memory_space<vmem>>, vector<48x100xf32>,
    return
  }
  func.func @transform_0(%arg0: i32) -> (i32, i32) {
    %c0_i32 = arith.constant 0 : i32
    %c0_i32_0 = arith.constant 0 : i32
    return %arg0, %c0_i32 : i32, i32
  }
  func.func @transform_1(%arg0: i32) -> (i32, i32) {
    %c0_i32 = arith.constant 0 : i32
    %c0_i32_0 = arith.constant 0 : i32
    return %arg0, %c0_i32 : i32, i32
  }
  func.func @transform_2(%arg0: i32) -> (i32, i32) {
    %c0_i32 = arith.constant 0 : i32
    %c0_i32_0 = arith.constant 0 : i32
    %c0_i32_1 = arith.constant 0 : i32
    return %c0_i32, %c0_i32_0 : i32, i32
  }
  func.func @transform_3(%arg0: i32) -> (i32, i32) {
    %c0_i32 = arith.constant 0 : i32
    %c0_i32_0 = arith.constant 0 : i32
    %c0_i32_1 = arith.constant 0 : i32
    return %c0_i32, %c0_i32_0 : i32, i32
  }
  func.func @transform_4(%arg0: i32) -> (i32, i32) {
    %c0_i32 = arith.constant 0 : i32
    %c0_i32_0 = arith.constant 0 : i32
    %c0_i32_1 = arith.constant 0 : i32
    return %c0_i32, %c0_i32_0 : i32, i32
  }
  func.func @transform_5(%arg0: i32) -> (i32, i32) {
    %c0_i32 = arith.constant 0 : i32
    %c0_i32_0 = arith.constant 0 : i32
    %c0_i32_1 = arith.constant 0 : i32
    return %c0_i32, %c0_i32_0 : i32, i32
  }
  func.func @transform_6(%arg0: i32) -> (i32, i32) {
    %c0_i32 = arith.constant 0 : i32
    %c0_i32_0 = arith.constant 0 : i32
    %c0_i32_1 = arith.constant 0 : i32
    return %c0_i32, %c0_i32_0 : i32, i32
  }
  func.func @transform_7(%arg0: i32) -> (i32, i32) {
    %c0_i32 = arith.constant 0 : i32
    %c0_i32_0 = arith.constant 0 : i32
    %c0_i32_1 = arith.constant 0 : i32
    return %c0_i32, %c0_i32_0 : i32, i32
  }
  func.func @transform_8(%arg0: i32) -> (i32, i32) {
    %c0_i32 = arith.constant 0 : i32
    %c0_i32_0 = arith.constant 0 : i32
    %c0_i32_1 = arith.constant 0 : i32
    return %c0_i32, %c0_i32_0 : i32, i32
  }
  func.func @transform_9(%arg0: i32) -> (i32, i32) {
    %c0_i32 = arith.constant 0 : i32
    %c0_i32_0 = arith.constant 0 : i32
    %c0_i32_1 = arith.constant 0 : i32
    return %c0_i32, %c0_i32_0 : i32, i32
  }
  func.func @transform_10(%arg0: i32) -> (i32, i32) {
    %c0_i32 = arith.constant 0 : i32
    %c0_i32_0 = arith.constant 0 : i32
    %c0_i32_1 = arith.constant 0 : i32
    return %c0_i32, %c0_i32_0 : i32, i32
  }
  func.func @transform_11(%arg0: i32) -> (i32, i32) {
    %c0_i32 = arith.constant 0 : i32
    %c0_i32_0 = arith.constant 0 : i32
    return %arg0, %c0_i32 : i32, i32
  }
}

module attributes {stable_mosaic.version = 11 : i64} {
  func.func @_gcn_chain_kernel(%arg0: i32, %arg1: memref<48x32xf32, #tpu.memory_space<vmem>>, %arg2: memref<48x100xf32, #tpu.memory_space<vmem>>, %arg3: memref<48x100xf32, #tpu.memory_space<vmem>>, %arg4: memref<32x16xf32, #tpu.memory_space<vmem>>, %arg5: memref<100x16xf32, #tpu.memory_space<vmem>>, %arg6: memref<100x16xf32, #tpu.memory_space<vmem>>, %arg7: memref<48x48xf32, #tpu.memory_space<vmem>>, %arg8: memref<48x16xf32, #tpu.memory_space<vmem>>, %arg9: memref<48x16xf32, #tpu.memory_space<vmem>>, %arg10: memref<48x16xf32, #tpu.memory_space<vmem>>, %arg11: memref<48x16xf32, #tpu.memory_space<vmem>>) attributes {dimension_semantics = [#tpu.dimension_semantics<parallel>], iteration_bounds = array<i64: 2>, scalar_prefetch = 0 : i64, scratch_operands = 0 : i64, tpu.core_type = #tpu.core_type<tc>, window_params = [{transform_indices = @transform_0, window_bounds = array<i64: 48, 32>}, {transform_indices = @transform_1, window_bounds = array<i64: 48, 100>}, {transform_indices = @transform_2, window_bounds = array<i64: 48, 100>}, {pipeline_mode = #tpu.pipeline_mode<synchronous>, transform_indices = @transform_3, window_bounds = array<i64: 32, 16>}, {pipeline_mode = #tpu.pipeline_mode<synchronous>, transform_indices = @transform_4, window_bounds = array<i64: 100, 16>}, {pipeline_mode = #tpu.pipeline_mode<synchronous>, transform_indices = @transform_5, window_bounds = array<i64: 100, 16>}, {pipeline_mode = #tpu.pipeline_mode<synchronous>, transform_indices = @transform_6, window_bounds = array<i64: 48, 48>}, {pipeline_mode = #tpu.pipeline_mode<synchronous>, transform_indices = @transform_7, window_bounds = array<i64: 48, 16>}, {pipeline_mode = #tpu.pipeline_mode<synchronous>, transform_indices = @transform_8, window_bounds = array<i64: 48, 16>}, {transform_indices = @transform_9, window_bounds = array<i64: 48, 16>}, {transform_indices = @transform_10, window_bounds = array<i64: 48, 16>}]} {
    %c0 = arith.constant 0 : index
    %c0_0 = arith.constant 0 : index
    %0 = vector.load %arg1[%c0, %c0_0] : memref<48x32xf32, #tpu.memory_space<vmem>>, vector<48x32xf32>
    %c0_1 = arith.constant 0 : index
    %c0_2 = arith.constant 0 : index
    %1 = vector.load %arg4[%c0_1, %c0_2] : memref<32x16xf32, #tpu.memory_space<vmem>>, vector<32x16xf32>
    %cst = arith.constant dense<0.000000e+00> : vector<48x16xf32>
    %2 = tpu.matmul %0, %1, %cst {dimension_numbers = #tpu.dot_dimension_numbers<[1], [0], [0], [1], [0, 0, 1, 1], [], []>} : vector<48x32xf32>, vector<32x16xf32>, vector<48x16xf32> -> vector<48x16xf32>
    %c0_3 = arith.constant 0 : index
    %c0_4 = arith.constant 0 : index
    %3 = vector.load %arg2[%c0_3, %c0_4] : memref<48x100xf32, #tpu.memory_space<vmem>>, vector<48x100xf32>
    %c0_5 = arith.constant 0 : index
    %c0_6 = arith.constant 0 : index
    %4 = vector.load %arg5[%c0_5, %c0_6] : memref<100x16xf32, #tpu.memory_space<vmem>>, vector<100x16xf32>
    %cst_7 = arith.constant dense<0.000000e+00> : vector<48x16xf32>
    %5 = tpu.matmul %3, %4, %cst_7 {dimension_numbers = #tpu.dot_dimension_numbers<[1], [0], [0], [1], [0, 0, 1, 1], [], []>} : vector<48x100xf32>, vector<100x16xf32>, vector<48x16xf32> -> vector<48x16xf32>
    %6 = arith.addf %2, %5 : vector<48x16xf32>
    %c0_8 = arith.constant 0 : index
    %c0_9 = arith.constant 0 : index
    %7 = vector.load %arg3[%c0_8, %c0_9] : memref<48x100xf32, #tpu.memory_space<vmem>>, vector<48x100xf32>
    %c0_10 = arith.constant 0 : index
    %c0_11 = arith.constant 0 : index
    %8 = vector.load %arg6[%c0_10, %c0_11] : memref<100x16xf32, #tpu.memory_space<vmem>>, vector<100x16xf32>
    %cst_12 = arith.constant dense<0.000000e+00> : vector<48x16xf32>
    %9 = tpu.matmul %7, %8, %cst_12 {dimension_numbers = #tpu.dot_dimension_numbers<[1], [0], [0], [1], [0, 0, 1, 1], [], []>} : vector<48x100xf32>, vector<100x16xf32>, vector<48x16xf32> -> vector<48x16xf32>
    %10 = arith.addf %6, %9 : vector<48x16xf32>
    %c0_13 = arith.constant 0 : index
    %c0_14 = arith.constant 0 : index
    %11 = vector.load %arg7[%c0_13, %c0_14] : memref<48x48xf32, #tpu.memory_space<vmem>>, vector<48x48xf32>
    %c0_15 = arith.constant 0 : index
    %c0_16 = arith.constant 0 : index
    %12 = vector.load %arg8[%c0_15, %c0_16] : memref<48x16xf32, #tpu.memory_space<vmem>>, vector<48x16xf32>
    %c0_17 = arith.constant 0 : index
    %c0_18 = arith.constant 0 : index
    %13 = vector.load %arg9[%c0_17, %c0_18] : memref<48x16xf32, #tpu.memory_space<vmem>>, vector<48x16xf32>
    %cst_19 = arith.constant dense<0.000000e+00> : vector<48x16xf32>
    %14 = tpu.matmul %11, %10, %cst_19 {dimension_numbers = #tpu.dot_dimension_numbers<[1], [0], [0], [1], [0, 0, 1, 1], [], []>} : vector<48x48xf32>, vector<48x16xf32>, vector<48x16xf32> -> vector<48x16xf32>
    %15 = arith.mulf %14, %12 : vector<48x16xf32>
    %16 = arith.addf %15, %13 : vector<48x16xf32>
    %c0_20 = arith.constant 0 : index
    %c0_21 = arith.constant 0 : index
    %17 = vector.load %arg10[%c0_20, %c0_21] : memref<48x16xf32, #tpu.memory_space<vmem>>, vector<48x16xf32>
    %18 = arith.addf %16, %17 : vector<48x16xf32>
    %c0_22 = arith.constant 0 : index
    %c0_23 = arith.constant 0 : index
    %19 = vector.load %arg11[%c0_22, %c0_23] : memref<48x16xf32, #tpu.memory_space<vmem>>, vector<48x16xf32>
    tpu.vector_store %arg11[%c0_22, %c0_23], %18 {strides = array<i32>} : memref<48x16xf32, #tpu.memory_space<vmem>>, vector<48x16xf32>,
    return
  }
  func.func @transform_0(%arg0: i32) -> (i32, i32) {
    %c0_i32 = arith.constant 0 : i32
    %c0_i32_0 = arith.constant 0 : i32
    return %arg0, %c0_i32 : i32, i32
  }
  func.func @transform_1(%arg0: i32) -> (i32, i32) {
    %c0_i32 = arith.constant 0 : i32
    %c0_i32_0 = arith.constant 0 : i32
    return %arg0, %c0_i32 : i32, i32
  }
  func.func @transform_2(%arg0: i32) -> (i32, i32) {
    %c0_i32 = arith.constant 0 : i32
    %c0_i32_0 = arith.constant 0 : i32
    return %arg0, %c0_i32 : i32, i32
  }
  func.func @transform_3(%arg0: i32) -> (i32, i32) {
    %c0_i32 = arith.constant 0 : i32
    %c0_i32_0 = arith.constant 0 : i32
    %c0_i32_1 = arith.constant 0 : i32
    return %c0_i32, %c0_i32_0 : i32, i32
  }
  func.func @transform_4(%arg0: i32) -> (i32, i32) {
    %c0_i32 = arith.constant 0 : i32
    %c0_i32_0 = arith.constant 0 : i32
    %c0_i32_1 = arith.constant 0 : i32
    return %c0_i32, %c0_i32_0 : i32, i32
  }
  func.func @transform_5(%arg0: i32) -> (i32, i32) {
    %c0_i32 = arith.constant 0 : i32
    %c0_i32_0 = arith.constant 0 : i32
    %c0_i32_1 = arith.constant 0 : i32
    return %c0_i32, %c0_i32_0 : i32, i32
  }
  func.func @transform_6(%arg0: i32) -> (i32, i32) {
    %c0_i32 = arith.constant 0 : i32
    %c0_i32_0 = arith.constant 0 : i32
    %c0_i32_1 = arith.constant 0 : i32
    return %c0_i32, %c0_i32_0 : i32, i32
  }
  func.func @transform_7(%arg0: i32) -> (i32, i32) {
    %c0_i32 = arith.constant 0 : i32
    %c0_i32_0 = arith.constant 0 : i32
    %c0_i32_1 = arith.constant 0 : i32
    return %c0_i32, %c0_i32_0 : i32, i32
  }
  func.func @transform_8(%arg0: i32) -> (i32, i32) {
    %c0_i32 = arith.constant 0 : i32
    %c0_i32_0 = arith.constant 0 : i32
    %c0_i32_1 = arith.constant 0 : i32
    return %c0_i32, %c0_i32_0 : i32, i32
  }
  func.func @transform_9(%arg0: i32) -> (i32, i32) {
    %c0_i32 = arith.constant 0 : i32
    %c0_i32_0 = arith.constant 0 : i32
    return %arg0, %c0_i32 : i32, i32
  }
  func.func @transform_10(%arg0: i32) -> (i32, i32) {
    %c0_i32 = arith.constant 0 : i32
    %c0_i32_0 = arith.constant 0 : i32
    return %arg0, %c0_i32 : i32, i32
  }
}

</mosaic_0001>

<bundles_post_ra>
// kernel: dense_gcn_forward_pallas.5
= control target key start
LH: loop header
LB: loop body
LE: loop exit
PB: predicated region body
PF: predicated region fallthrough
CT: control target
= control target key end

     0   :  { %s1182_s30 = smov 0   ;;  %s1376_s0 = inlined_call_operand.vmem [shape: f32[96,32], index: 0, kind: input, shape index: {}]   ;;  %s1377_s1 = inlined_call_operand.vmem [shape: f32[32,32], index: 1, kind: input, shape index: {}]   ;;  %s1378_s2 = inlined_call_operand.vmem [shape: f32[48,48], index: 2, kind: input, shape index: {}]   ;;  %s1379_s3 = inlined_call_operand.vmem [shape: f32[48,32], index: 3, kind: input, shape index: {}]   ;;  %s1380_s4 = inlined_call_operand.vmem [shape: f32[48,32], index: 4, kind: input, shape index: {}]   ;;  %s1381_s5 = inlined_call_operand.vmem [shape: f32[32,100], index: 5, kind: input, shape index: {}]   ;;  %s1382_s6 = inlined_call_operand.vmem [shape: f32[48,48], index: 6, kind: input, shape index: {}]   ;;  %s1383_s7 = inlined_call_operand.vmem [shape: f32[48,100], index: 7, kind: input, shape index: {}]   ;;  %s1384_s8 = inlined_call_operand.vmem [shape: f32[48,100], index: 8, kind: input, shape index: {}]   ;;  %s1385_s9 = inlined_call_operand.vmem [shape: f32[96,100], index: 9, kind: output, shape index: {}]  }
   0x1 LB: > { %s963_s10 = sadd.s32 4294967295, %s1130_s30   ;;  %p967_p0 = scmp.ge.s32.totalorder %s1130_s30, 1  ;;  %s1130_s30 = sphi %s1182_s30, %s19_s30  }
   0x2   : > { %p288_p1 = scmp.lt.s32.totalorder %s1130_s30, 3 }
   0x4   : > { %p289_p2 = pnand %p967_p0, %p288_p1 }
   0x5   : > { %s324_s15 = smul.u32 (!%p289_p2), 6, %s963_s10 }
   0x6   : > { %292 = sbr.rel (%p289_p2) target bundleno = 860 (0x35c), region = 56 }
   0x7   : > { %p325_p3 = scmp.lt.s32.totalorder (!%p289_p2), %s324_s15, 11 }
   0xb   : > { %v345_v0 = vld [vmem:[%s1377_s1 + $0x18] sm:$0xff]  ;;  %v344_v1 = vld [vmem:[%s1377_s1 + $0x10] sm:$0xff]  ;;  %v343_v2 = vld [vmem:[%s1377_s1 + $0x8] sm:$0xff]  ;;  %s1387_s15 = smov (!%p325_p3, %s324_s15), 11  ;;  %vm346_vm0 = vcmask 261120   ;;  %vm478_vm1 = vcmask 392192  }
   0xc   : > { %1040 = vmatprep.subr.mxu0 %v345_v0  ;;  %v342_v3 = vld [vmem:[%s1377_s1] sm:$0xff]  ;;  %s968_s20 = sshll.u32 %s1387_s15, 3  ;;  %v625_v11 = vld [vmem:[%s1381_s5 + $0x18] sm:$0xff]  ;;  %v461_v18 = vld [vmem:[%s1378_s2 + $0x8] sm:$0xff]  ;;  %vm900_vm8 = vcmask 818176  }
   0xd   : > { %1041 = vmatpush3.msra.mxu0 %v345_v0  ;;  %s328_s23 = scalar_lea.vmem %s1376_s0, %s968_s20  ;;  %v460_v10 = vld [vmem:[%s1378_s2] sm:$0xff]  ;;  %v462_v19 = vld [vmem:[%s1378_s2 + $0x10] sm:$0xff]  ;;  %v463_v20 = vld [vmem:[%s1378_s2 + $0x18] sm:$0xff]  ;;  %s1341_s22 = scalar_lea.vmem %s1385_s9, %s968_s20 }
   0xe   : > { %1042 = vmatprep.subr.mxu0 %v344_v1  ;;  %v336_v4 = vld [vmem:[%s328_s23] sm:$0xff]  ;;  %v337_v5 = vld [vmem:[%s328_s23 + $0x8] sm:$0xff]  ;;  %v338_v6 = vld [vmem:[%s328_s23 + $0x10] sm:$0xff]  ;;  %1069 = vmatprep.mubr.msk.f32.mxu1 %vm478_vm1, %v460_v10 }
   0xf   : > { %1043 = vmatpush3.msra.mxu0 %v344_v1  ;;  %1048 = vmatprep.mubr.msk.f32.mxu0 %vm346_vm0, %v336_v4  ;;  %v339_v7 = vld [vmem:[%s328_s23 + $0x18] sm:$0xff]  ;;  %v340_v8 = vld [vmem:[%s328_s23 + $0x20] sm:$0xff]  ;;  %v341_v9 = vld [vmem:[%s328_s23 + $0x28] sm:$0xff] }
  0x10   : > { %1044 = vmatprep.subr.mxu0 %v343_v2  ;;  %v464_v21 = vld [vmem:[%s1378_s2 + $0x20] sm:$0xff]  ;;  %v465_v22 = vld [vmem:[%s1378_s2 + $0x28] sm:$0xff]  ;;  %v624_v23 = vld [vmem:[%s1381_s5 + $0x10] sm:$0xff] }
  0x11   : > { %1045 = vmatpush3.msra.mxu0 %v343_v2  ;;  %v623_v24 = vld [vmem:[%s1381_s5 + $0x8] sm:$0xff]  ;;  %v622_v25 = vld [vmem:[%s1381_s5] sm:$0xff]  ;;  %v469_v33 = vld [vmem:[%s1379_s3 + $0x18] sm:$0xff] }
  0x12   : > { %1046 = vmatprep.subr.mxu0 %v342_v3  ;;  %v467_v26 = vld [vmem:[%s1379_s3 + $0x8] sm:$0xff]  ;;  %v466_v29 = vld [vmem:[%s1379_s3] sm:$0xff]  ;;  %v475_v36 = vld [vmem:[%s1380_s4 + $0x18] sm:$0xff] }
  0x13   : > { %1047 = vmatpush3.msra.mxu0 %v342_v3  ;;  %v473_v27 = vld [vmem:[%s1380_s4 + $0x8] sm:$0xff]  ;;  %v472_v31 = vld [vmem:[%s1380_s4] sm:$0xff]  ;;  %v468_v38 = vld [vmem:[%s1379_s3 + $0x10] sm:$0xff] }
  0x14   : > { %1049 = vmatmul.mubr.msk.f32.vlgmr.msra.gmra.mxu0 %vm346_vm0, %v337_v5  ;;  %1078 = vmatprep.subr.mxu0 %v625_v11  ;;  %v474_v42 = vld [vmem:[%s1380_s4 + $0x10] sm:$0xff]  ;;  %v471_v44 = vld [vmem:[%s1379_s3 + $0x28] sm:$0xff]  ;;  %v470_v50 = vld [vmem:[%s1379_s3 + $0x20] sm:$0xff] }
  0x15   : > { %1051 = vmatprep.mubr.msk.f32.mxu0 %vm346_vm0, %v338_v6  ;;  %1079 = vmatpush3.msra.mxu0 %v625_v11  ;;  %v477_v48 = vld [vmem:[%s1380_s4 + $0x28] sm:$0xff]  ;;  %v476_v56 = vld [vmem:[%s1380_s4 + $0x20] sm:$0xff] }
  0x16   : > { %1080 = vmatprep.subr.mxu0 %v624_v23  ;;  %v739_v4 = vld [vmem:[%s1382_s6] sm:$0xff]  ;;  %v740_v11 = vld [vmem:[%s1382_s6 + $0x8] sm:$0xff] }
  0x17   : > { %1081 = vmatpush3.msra.mxu0 %v624_v23  ;;  %v748_v23 = vld [vmem:[%s1383_s7 + $0x18] sm:$0xff] }
  0x18   : > { %1052 = vmatmul.mubr.msk.f32.gmra.mxu0 %vm346_vm0, %v339_v7  ;;  %1082 = vmatprep.subr.mxu0 %v623_v24 }
  0x19   : > { %1054 = vmatprep.mubr.msk.f32.mxu0 %vm346_vm0, %v340_v8  ;;  %1083 = vmatpush3.msra.mxu0 %v623_v24 }
  0x1a   : > { %1084 = vmatprep.subr.mxu0 %v622_v25 }
  0x1b   : > { %1085 = vmatpush3.msra.mxu0 %v622_v25 }
  0x1c   : > { %1055 = vmatmul.mubr.msk.f32.gmra.mxu0 %vm346_vm0, %v341_v9 }
  0xd4   : > { %v1050_v12 = vpop.f32.mrf.mxu0 }
  0xd6   : > { %v431_v13 = vpop.f32.mrf.mxu0 }
  0xd8   : > { %v1053_v14 = vpop.f32.mrf.mxu0 }
  0xda   : > { %v441_v15 = vpop.f32.mrf.mxu0 }
  0xdc   : > { %v1056_v16 = vpop.f32.mrf.mxu0 }
  0xdd   : > { %1057 = vmatprep.subr.mxu1 %v1056_v16 }
  0xde   : > { %v451_v17 = vpop.f32.mrf.mxu0  ;;  %1058 = vmatpush3.msra.mxu1 %v1056_v16  ;;  %v746_v16 = vld [vmem:[%s1383_s7 + $0x8] sm:$0xff] }
  0xdf   : > { %1059 = vmatprep.subr.mxu1 %v451_v17 }
  0xe0   : > { %1060 = vmatpush3.msra.mxu1 %v451_v17  ;;  %v752_v17 = vld [vmem:[%s1384_s8 + $0x8] sm:$0xff] }
  0xe1   : > { %1061 = vmatprep.subr.mxu1 %v1053_v14 }
  0xe2   : > { %1062 = vmatpush3.msra.mxu1 %v1053_v14  ;;  %v743_v14 = vld [vmem:[%s1382_s6 + $0x20] sm:$0xff] }
  0xe3   : > { %1063 = vmatprep.subr.mxu1 %v441_v15 }
  0xe4   : > { %1064 = vmatpush3.msra.mxu1 %v441_v15  ;;  %v744_v15 = vld [vmem:[%s1382_s6 + $0x28] sm:$0xff] }
  0xe5   : > { %1065 = vmatprep.subr.mxu1 %v1050_v12 }
  0xe6   : > { %1066 = vmatpush3.msra.mxu1 %v1050_v12  ;;  %v741_v12 = vld [vmem:[%s1382_s6 + $0x10] sm:$0xff] }
  0xe7   : > { %1067 = vmatprep.subr.mxu1 %v431_v13 }
  0xe8   : > { %1068 = vmatpush3.msra.mxu1 %v431_v13  ;;  %v742_v13 = vld [vmem:[%s1382_s6 + $0x18] sm:$0xff] }
  0xe9   : > { %1070 = vmatmul.mubr.msk.f32.vlgmr.msra.gmra.mxu1 %vm478_vm1, %v461_v18 }
  0xea   : > { %1072 = vmatprep.mubr.msk.f32.mxu1 %vm478_vm1, %v462_v19  ;;  %v745_v19 = vld [vmem:[%s1383_s7] sm:$0xff] }
  0xed   : > { %1073 = vmatmul.mubr.msk.f32.gmra.mxu1 %vm478_vm1, %v463_v20 }
  0xee   : > { %1075 = vmatprep.mubr.msk.f32.mxu1 %vm478_vm1, %v464_v21  ;;  %v751_v21 = vld [vmem:[%s1384_s8] sm:$0xff] }
  0xf1   : > { %1076 = vmatmul.mubr.msk.f32.gmra.mxu1 %vm478_vm1, %v465_v22 }
  0xf2   : > { %1107 = vmatprep.mubr.msk.f32.mxu1 %vm478_vm1, %v739_v4 }
 0x1a9   : > { %v1071_v28 = vpop.f32.mrf.mxu1 }
 0x1aa   : > { %v593_v30 = vmul.f32 %v1071_v28, %v467_v26  ;;  %v754_v26 = vld [vmem:[%s1384_s8 + $0x18] sm:$0xff] }
 0x1ab   : > { %v563_v32 = vpop.f32.mrf.mxu1 }
 0x1ac   : > { %v599_v34 = vadd.f32 %v593_v30, %v473_v27  ;;  %v592_v35 = vmul.f32 %v563_v32, %v466_v29 }
 0x1ad   : > { %v1074_v37 = vpop.f32.mrf.mxu1 }
 0x1ae   : > { %v598_v39 = vadd.f32 %v592_v35, %v472_v31  ;;  %v595_v40 = vmul.f32 %v1074_v37, %v469_v33  ;;  %v611_v41 = vmul.f32 0.01, %v599_v34  ;;  %vm605_vm2 = vcmp.gt.f32.partialorder %v599_v34, 0.0  ;;  %v747_v31 = vld [vmem:[%s1383_s7 + $0x10] sm:$0xff]  ;;  %v750_v33 = vld [vmem:[%s1383_s7 + $0x28] sm:$0xff] }
 0x1af   : > { %v573_v43 = vpop.f32.mrf.mxu1  ;;  %v753_v37 = vld [vmem:[%s1384_s8 + $0x10] sm:$0xff] }
 0x1b0   : > { %v610_v45 = vmul.f32 0.01, %v598_v39  ;;  %v601_v46 = vadd.f32 %v595_v40, %v475_v36  ;;  %v594_v47 = vmul.f32 %v573_v43, %v468_v38  ;;  %vm604_vm3 = vcmp.gt.f32.partialorder %v598_v39, 0.0 }
 0x1b1   : > { %v1077_v49 = vpop.f32.mrf.mxu1  ;;  %v617_v54 = vsel %vm605_vm2, %v599_v34, %v611_v41  ;;  %v749_v41 = vld [vmem:[%s1383_s7 + $0x20] sm:$0xff] }
 0x1b2   : > { %v600_v51 = vadd.f32 %v594_v47, %v474_v42  ;;  %v597_v52 = vmul.f32 %v1077_v49, %v471_v44  ;;  %v616_v53 = vsel %vm604_vm3, %v598_v39, %v610_v45  ;;  %v613_v55 = vmul.f32 0.01, %v601_v46  ;;  %v756_v39 = vld [vmem:[%s1384_s8 + $0x28] sm:$0xff] }
 0x1b3   : > { %v583_v57 = vpop.f32.mrf.mxu1  ;;  %1086 = vmatprep.mubr.msk.f32.mxu0 %vm346_vm0, %v616_v53  ;;  %vm607_vm4 = vcmp.gt.f32.partialorder %v601_v46, 0.0 }
 0x1b4   : > { %v612_v58 = vmul.f32 0.01, %v600_v51  ;;  %v603_v59 = vadd.f32 %v597_v52, %v477_v48  ;;  %v596_v60 = vmul.f32 %v583_v57, %v470_v50  ;;  %1087 = vmatmul.mubr.msk.f32.vlgmr.msra.gmra.mxu0 %vm346_vm0, %v617_v54  ;;  %vm606_vm5 = vcmp.gt.f32.partialorder %v600_v51, 0.0 }
 0x1b5   : > { %v619_v0 = vsel %vm607_vm4, %v601_v46, %v613_v55  ;;  %v755_v46 = vld [vmem:[%s1384_s8 + $0x20] sm:$0xff] }
 0x1b6   : > { %v602_v61 = vadd.f32 %v596_v60, %v476_v56  ;;  %v618_v62 = vsel %vm606_vm5, %v600_v51, %v612_v58  ;;  %v615_v63 = vmul.f32 0.01, %v603_v59  ;;  %vm609_vm7 = vcmp.gt.f32.partialorder %v603_v59, 0.0 }
 0x1b7   : > { %1089 = vmatprep.mubr.msk.f32.mxu0 %vm346_vm0, %v618_v62 }
 0x1b8   : > { %v614_v1 = vmul.f32 0.01, %v602_v61  ;;  %1090 = vmatmul.mubr.msk.f32.gmra.mxu0 %vm346_vm0, %v619_v0  ;;  %vm608_vm6 = vcmp.gt.f32.partialorder %v602_v61, 0.0  ;;  %v621_v3 = vsel %vm609_vm7, %v603_v59, %v615_v63 }
 0x1ba   : > { %v620_v2 = vsel %vm608_vm6, %v602_v61, %v614_v1 }
 0x1bb   : > { %1092 = vmatprep.mubr.msk.f32.mxu0 %vm346_vm0, %v620_v2 }
 0x1bc   : > { %1093 = vmatmul.mubr.msk.f32.gmra.mxu0 %vm346_vm0, %v621_v3 }
 0x274   : > { %v1088_v5 = vpop.f32.mrf.mxu0 }
 0x276   : > { %v710_v6 = vpop.f32.mrf.mxu0 }
 0x278   : > { %v1091_v7 = vpop.f32.mrf.mxu0 }
 0x27a   : > { %v720_v8 = vpop.f32.mrf.mxu0 }
 0x27c   : > { %v1094_v9 = vpop.f32.mrf.mxu0 }
 0x27d   : > { %1095 = vmatprep.subr.mxu1 %v1094_v9 }
 0x27e   : > { %v730_v10 = vpop.f32.mrf.mxu0  ;;  %1096 = vmatpush3.msra.mxu1 %v1094_v9 }
 0x27f   : > { %1097 = vmatprep.subr.mxu1 %v730_v10 }
 0x280   : > { %1098 = vmatpush3.msra.mxu1 %v730_v10 }
 0x281   : > { %1099 = vmatprep.subr.mxu1 %v1091_v7 }
 0x282   : > { %1100 = vmatpush3.msra.mxu1 %v1091_v7 }
 0x283   : > { %1101 = vmatprep.subr.mxu1 %v720_v8 }
 0x284   : > { %1102 = vmatpush3.msra.mxu1 %v720_v8 }
 0x285   : > { %1103 = vmatprep.subr.mxu1 %v1088_v5 }
 0x286   : > { %1104 = vmatpush3.msra.mxu1 %v1088_v5 }
 0x287   : > { %1105 = vmatprep.subr.mxu1 %v710_v6 }
 0x288   : > { %1106 = vmatpush3.msra.mxu1 %v710_v6 }
 0x289   : > { %1108 = vmatmul.mubr.msk.f32.vlgmr.msra.gmra.mxu1 %vm478_vm1, %v740_v11 }
 0x28a   : > { %1110 = vmatprep.mubr.msk.f32.mxu1 %vm478_vm1, %v741_v12 }
 0x28d   : > { %1111 = vmatmul.mubr.msk.f32.gmra.mxu1 %vm478_vm1, %v742_v13 }
 0x28e   : > { %1113 = vmatprep.mubr.msk.f32.mxu1 %vm478_vm1, %v743_v14 }
 0x291   : > { %1114 = vmatmul.mubr.msk.f32.gmra.mxu1 %vm478_vm1, %v744_v15 }
 0x349   : > { %v1109_v18 = vpop.f32.mrf.mxu1 }
 0x34a   : > { %v871_v20 = vmul.f32 %v1109_v18, %v746_v16 }
 0x34b   : > { %v841_v22 = vpop.f32.mrf.mxu1 }
 0x34c   : > { %v877_v24 = vadd.f32 %v871_v20, %v752_v17  ;;  %v870_v25 = vmul.f32 %v841_v22, %v745_v19 }
 0x34d   : > { %v1112_v27 = vpop.f32.mrf.mxu1 }
 0x34e   : > { %vm883_vm9 = vcmp.gt.f32.partialorder %v877_v24, 0.0  ;;  %v889_v28 = vmul.f32 0.01, %v877_v24  ;;  %v876_v29 = vadd.f32 %v870_v25, %v751_v21  ;;  %v873_v30 = vmul.f32 %v1112_v27, %v748_v23 }
 0x34f   : > { %v851_v32 = vpop.f32.mrf.mxu1 }
 0x350   : > { %v895_v34 = vsel %vm883_vm9, %v877_v24, %v889_v28  ;;  %vm882_vm10 = vcmp.gt.f32.partialorder %v876_v29, 0.0  ;;  %v888_v35 = vmul.f32 0.01, %v876_v29  ;;  %v879_v36 = vadd.f32 %v873_v30, %v754_v26 }
 0x351   : > { %902 = vst.msk [vmem:[%s1341_s22 + $0x8] sm:$0xff] %vm900_vm8, %v895_v34  ;;  %v872_v38 = vmul.f32 %v851_v32, %v747_v31  ;;  %v1115_v40 = vpop.f32.mrf.mxu1 }
 0x352   : > { %v894_v42 = vsel %vm882_vm10, %v876_v29, %v888_v35  ;;  %vm885_vm11 = vcmp.gt.f32.partialorder %v879_v36, 0.0  ;;  %v891_v43 = vmul.f32 0.01, %v879_v36  ;;  %v875_v44 = vmul.f32 %v1115_v40, %v750_v33 }
 0x353   : > { %901 = vst.msk [vmem:[%s1341_s22] sm:$0xff] %vm900_vm8, %v894_v42  ;;  %v878_v45 = vadd.f32 %v872_v38, %v753_v37  ;;  %v861_v47 = vpop.f32.mrf.mxu1 }
 0x354   : > { %v897_v48 = vsel %vm885_vm11, %v879_v36, %v891_v43  ;;  %v881_v49 = vadd.f32 %v875_v44, %v756_v39  ;;  %v874_v50 = vmul.f32 %v861_v47, %v749_v41 }
 0x355   : > { %904 = vst.msk [vmem:[%s1341_s22 + $0x18] sm:$0xff] %vm900_vm8, %v897_v48  ;;  %vm884_vm12 = vcmp.gt.f32.partialorder %v878_v45, 0.0  ;;  %v890_v51 = vmul.f32 0.01, %v878_v45 }
 0x356   : > { %vm887_vm13 = vcmp.gt.f32.partialorder %v881_v49, 0.0  ;;  %v893_v52 = vmul.f32 0.01, %v881_v49  ;;  %v880_v53 = vadd.f32 %v874_v50, %v755_v46 }
 0x357   : > { %v896_v54 = vsel %vm884_vm12, %v878_v45, %v890_v51 }
 0x358   : > { %903 = vst.msk [vmem:[%s1341_s22 + $0x10] sm:$0xff] %vm900_vm8, %v896_v54  ;;  %v899_v55 = vsel %vm887_vm13, %v881_v49, %v893_v52  ;;  %vm886_vm14 = vcmp.gt.f32.partialorder %v880_v53, 0.0  ;;  %v892_v56 = vmul.f32 0.01, %v880_v53 }
 0x359   : > { %906 = vst.msk [vmem:[%s1341_s22 + $0x28] sm:$0xff] %vm900_vm8, %v899_v55 }
 0x35a   : > { %v898_v57 = vsel %vm886_vm14, %v880_v53, %v892_v56 }
 0x35b   : > { %905 = vst.msk [vmem:[%s1341_s22 + $0x20] sm:$0xff] %vm900_vm8, %v898_v57 }
 0x35c PF: > { %s19_s30 = sadd.s32 1, %s1130_s30  }
 0x35d   : > { %p16_p4 = scmp.ge.s32.totalorder %s19_s30, 4  }
 0x35f   :  { %18 = sbr.rel (!%p16_p4) target bundleno = 1 (0x1), region = 86 }

// kernel: dense_gcn_forward_pallas.4
= control target key start
LH: loop header
LB: loop body
LE: loop exit
PB: predicated region body
PF: predicated region fallthrough
CT: control target
= control target key end

     0   :  { %s708_s18 = smov 0   ;;  %s812_s0 = inlined_call_operand.vmem [shape: f32[96,16], index: 0, kind: input, shape index: {}]   ;;  %s813_s1 = inlined_call_operand.vmem [shape: f32[16,32], index: 1, kind: input, shape index: {}]   ;;  %s814_s2 = inlined_call_operand.vmem [shape: f32[48,48], index: 2, kind: input, shape index: {}]   ;;  %s815_s3 = inlined_call_operand.vmem [shape: f32[48,32], index: 3, kind: input, shape index: {}]   ;;  %s816_s4 = inlined_call_operand.vmem [shape: f32[48,32], index: 4, kind: input, shape index: {}]   ;;  %s817_s5 = inlined_call_operand.vmem [shape: f32[96,32], index: 5, kind: output, shape index: {}]  }
   0x1 LB: > { %s575_s19 = sadd.s32 4294967295, %s676_s18   ;;  %p579_p0 = scmp.ge.s32.totalorder %s676_s18, 1  ;;  %s676_s18 = sphi %s708_s18, %s15_s18  }
   0x2   : > { %p188_p1 = scmp.lt.s32.totalorder %s676_s18, 3 }
   0x4   : > { %p189_p2 = pnand %p579_p0, %p188_p1 }
   0x5   : > { %s216_s24 = smul.u32 (!%p189_p2), 6, %s575_s19 }
   0x6   : > { %192 = sbr.rel (%p189_p2) target bundleno = 436 (0x1b4), region = 40 }
   0x7   : > { %p217_p3 = scmp.lt.s32.totalorder (!%p189_p2), %s216_s24, 11 }
   0xb   : > { %v235_v0 = vld [vmem:[%s813_s1 + $0x8] sm:$0xff]  ;;  %v234_v1 = vld [vmem:[%s813_s1] sm:$0xff]  ;;  %s819_s24 = smov (!%p217_p3, %s216_s24), 11  ;;  %vm236_vm0 = vcmask 130048   ;;  %vm368_vm1 = vcmask 392192   ;;  %v352_v9 = vld [vmem:[%s814_s2 + $0x10] sm:$0xff] }
   0xc   : > { %616 = vmatprep.subr.mxu0 %v235_v0  ;;  %s580_s25 = sshll.u32 %s819_s24, 3  ;;  %v350_v8 = vld [vmem:[%s814_s2] sm:$0xff]  ;;  %644 = vmatprep.mubr.msk.f32.mxu1 %vm368_vm1, %v352_v9  ;;  %v351_v16 = vld [vmem:[%s814_s2 + $0x8] sm:$0xff]  ;;  %v353_v17 = vld [vmem:[%s814_s2 + $0x18] sm:$0xff]  ;;  %vm512_vm2 = vcmask 261120  }
   0xd   : > { %617 = vmatpush3.msra.mxu0 %v235_v0  ;;  %s220_s28 = scalar_lea.vmem %s812_s0, %s580_s25  ;;  %v354_v18 = vld [vmem:[%s814_s2 + $0x20] sm:$0xff]  ;;  %v355_v19 = vld [vmem:[%s814_s2 + $0x28] sm:$0xff]  ;;  %v359_v21 = vld [vmem:[%s815_s3 + $0x18] sm:$0xff]  ;;  %s789_s16 = scalar_lea.vmem %s817_s5, %s580_s25 }
   0xe   : > { %618 = vmatprep.subr.mxu0 %v234_v1  ;;  %v228_v2 = vld [vmem:[%s220_s28] sm:$0xff]  ;;  %v229_v3 = vld [vmem:[%s220_s28 + $0x8] sm:$0xff]  ;;  %v230_v4 = vld [vmem:[%s220_s28 + $0x10] sm:$0xff] }
   0xf   : > { %619 = vmatpush3.msra.mxu0 %v234_v1  ;;  %620 = vmatprep.mubr.msk.f32.mxu0 %vm236_vm0, %v228_v2  ;;  %v231_v5 = vld [vmem:[%s220_s28 + $0x18] sm:$0xff]  ;;  %v232_v6 = vld [vmem:[%s220_s28 + $0x20] sm:$0xff]  ;;  %v233_v7 = vld [vmem:[%s220_s28 + $0x28] sm:$0xff] }
  0x10   : > { %621 = vmatmul.mubr.msk.f32.vlgmr.msra.gmra.mxu0 %vm236_vm0, %v229_v3  ;;  %v357_v20 = vld [vmem:[%s815_s3 + $0x8] sm:$0xff]  ;;  %v365_v24 = vld [vmem:[%s816_s4 + $0x18] sm:$0xff]  ;;  %v356_v26 = vld [vmem:[%s815_s3] sm:$0xff] }
  0x11   : > { %623 = vmatprep.mubr.msk.f32.mxu0 %vm236_vm0, %v230_v4  ;;  %v363_v22 = vld [vmem:[%s816_s4 + $0x8] sm:$0xff]  ;;  %v358_v27 = vld [vmem:[%s815_s3 + $0x10] sm:$0xff]  ;;  %v362_v34 = vld [vmem:[%s816_s4] sm:$0xff] }
  0x12   : > { %v364_v36 = vld [vmem:[%s816_s4 + $0x10] sm:$0xff]  ;;  %v361_v38 = vld [vmem:[%s815_s3 + $0x28] sm:$0xff]  ;;  %v360_v40 = vld [vmem:[%s815_s3 + $0x20] sm:$0xff] }
  0x13   : > { %v367_v45 = vld [vmem:[%s816_s4 + $0x28] sm:$0xff]  ;;  %v366_v47 = vld [vmem:[%s816_s4 + $0x20] sm:$0xff] }
  0x14   : > { %624 = vmatmul.mubr.msk.f32.gmra.mxu0 %vm236_vm0, %v231_v5 }
  0x15   : > { %626 = vmatprep.mubr.msk.f32.mxu0 %vm236_vm0, %v232_v6 }
  0x18   : > { %627 = vmatmul.mubr.msk.f32.gmra.mxu0 %vm236_vm0, %v233_v7 }
  0x19   : > { %641 = vmatprep.mubr.msk.f32.mxu0 %vm368_vm1, %v350_v8 }
  0xd0   : > { %v622_v10 = vpop.f32.mrf.mxu0 }
  0xd2   : > { %v321_v11 = vpop.f32.mrf.mxu0 }
  0xd4   : > { %v625_v12 = vpop.f32.mrf.mxu0 }
  0xd6   : > { %v331_v13 = vpop.f32.mrf.mxu0 }
  0xd8   : > { %v628_v14 = vpop.f32.mrf.mxu0 }
  0xd9   : > { %629 = vmatprep.subr.mxu0 %v628_v14  ;;  %650 = vmatprep.subr.mxu1 %v628_v14 }
  0xda   : > { %v341_v15 = vpop.f32.mrf.mxu0  ;;  %630 = vmatpush3.msra.mxu0 %v628_v14  ;;  %656 = vmatpush3.msra.mxu1 %v628_v14 }
  0xdb   : > { %631 = vmatprep.subr.mxu0 %v341_v15  ;;  %651 = vmatprep.subr.mxu1 %v341_v15 }
  0xdc   : > { %632 = vmatpush3.msra.mxu0 %v341_v15  ;;  %657 = vmatpush3.msra.mxu1 %v341_v15 }
  0xdd   : > { %633 = vmatprep.subr.mxu0 %v625_v12  ;;  %652 = vmatprep.subr.mxu1 %v625_v12 }
  0xde   : > { %634 = vmatpush3.msra.mxu0 %v625_v12  ;;  %658 = vmatpush3.msra.mxu1 %v625_v12 }
  0xdf   : > { %635 = vmatprep.subr.mxu0 %v331_v13  ;;  %653 = vmatprep.subr.mxu1 %v331_v13 }
  0xe0   : > { %636 = vmatpush3.msra.mxu0 %v331_v13  ;;  %659 = vmatpush3.msra.mxu1 %v331_v13 }
  0xe1   : > { %637 = vmatprep.subr.mxu0 %v622_v10  ;;  %654 = vmatprep.subr.mxu1 %v622_v10 }
  0xe2   : > { %638 = vmatpush3.msra.mxu0 %v622_v10  ;;  %660 = vmatpush3.msra.mxu1 %v622_v10 }
  0xe3   : > { %639 = vmatprep.subr.mxu0 %v321_v11  ;;  %655 = vmatprep.subr.mxu1 %v321_v11 }
  0xe4   : > { %640 = vmatpush3.msra.mxu0 %v321_v11  ;;  %661 = vmatpush3.msra.mxu1 %v321_v11 }
  0xe5   : > { %642 = vmatmul.mubr.msk.f32.vlgmr.msra.gmra.mxu0 %vm368_vm1, %v351_v16  ;;  %645 = vmatmul.mubr.msk.f32.vlgmr.msra.gmra.mxu1 %vm368_vm1, %v353_v17 }
  0xe6   : > { %647 = vmatprep.mubr.msk.f32.mxu1 %vm368_vm1, %v354_v18 }
  0xe9   : > { %648 = vmatmul.mubr.msk.f32.gmra.mxu1 %vm368_vm1, %v355_v19 }
 0x1a5   : > { %v643_v23 = vpop.f32.mrf.mxu0  ;;  %v646_v25 = vpop.f32.mrf.mxu1 }
 0x1a6   : > { %v483_v28 = vmul.f32 %v643_v23, %v357_v20  ;;  %v485_v29 = vmul.f32 %v646_v25, %v359_v21 }
 0x1a7   : > { %v453_v30 = vpop.f32.mrf.mxu0  ;;  %v463_v31 = vpop.f32.mrf.mxu1 }
 0x1a8   : > { %v489_v32 = vadd.f32 %v483_v28, %v363_v22  ;;  %v491_v33 = vadd.f32 %v485_v29, %v365_v24  ;;  %v482_v35 = vmul.f32 %v453_v30, %v356_v26  ;;  %v484_v37 = vmul.f32 %v463_v31, %v358_v27 }
 0x1a9   : > { %v649_v39 = vpop.f32.mrf.mxu1 }
 0x1aa   : > { %vm495_vm3 = vcmp.gt.f32.partialorder %v489_v32, 0.0  ;;  %v501_v41 = vmul.f32 0.01, %v489_v32  ;;  %vm497_vm4 = vcmp.gt.f32.partialorder %v491_v33, 0.0  ;;  %v503_v42 = vmul.f32 0.01, %v491_v33 }
 0x1ab   : > { %v488_v43 = vadd.f32 %v482_v35, %v362_v34  ;;  %v490_v44 = vadd.f32 %v484_v37, %v364_v36  ;;  %v487_v46 = vmul.f32 %v649_v39, %v361_v38  ;;  %v473_v48 = vpop.f32.mrf.mxu1 }
 0x1ac   : > { %v507_v49 = vsel %vm495_vm3, %v489_v32, %v501_v41  ;;  %v509_v50 = vsel %vm497_vm4, %v491_v33, %v503_v42  ;;  %v486_v51 = vmul.f32 %v473_v48, %v360_v40 }
 0x1ad   : > { %514 = vst.msk [vmem:[%s789_s16 + $0x8] sm:$0xff] %vm512_vm2, %v507_v49  ;;  %516 = vst.msk [vmem:[%s789_s16 + $0x18] sm:$0xff] %vm512_vm2, %v509_v50  ;;  %vm494_vm5 = vcmp.gt.f32.partialorder %v488_v43, 0.0  ;;  %v500_v52 = vmul.f32 0.01, %v488_v43  ;;  %vm496_vm6 = vcmp.gt.f32.partialorder %v490_v44, 0.0  ;;  %v493_v54 = vadd.f32 %v487_v46, %v367_v45 }
 0x1ae   : > { %v502_v53 = vmul.f32 0.01, %v490_v44  ;;  %v492_v55 = vadd.f32 %v486_v51, %v366_v47 }
 0x1af   : > { %v506_v56 = vsel %vm494_vm5, %v488_v43, %v500_v52  ;;  %vm499_vm7 = vcmp.gt.f32.partialorder %v493_v54, 0.0  ;;  %v505_v58 = vmul.f32 0.01, %v493_v54 }
 0x1b0   : > { %v508_v57 = vsel %vm496_vm6, %v490_v44, %v502_v53  ;;  %513 = vst.msk [vmem:[%s789_s16] sm:$0xff] %vm512_vm2, %v506_v56  ;;  %vm498_vm8 = vcmp.gt.f32.partialorder %v492_v55, 0.0  ;;  %v504_v59 = vmul.f32 0.01, %v492_v55 }
 0x1b1   : > { %515 = vst.msk [vmem:[%s789_s16 + $0x10] sm:$0xff] %vm512_vm2, %v508_v57  ;;  %v511_v60 = vsel %vm499_vm7, %v493_v54, %v505_v58 }
 0x1b2   : > { %v510_v61 = vsel %vm498_vm8, %v492_v55, %v504_v59  ;;  %518 = vst.msk [vmem:[%s789_s16 + $0x28] sm:$0xff] %vm512_vm2, %v511_v60 }
 0x1b3   : > { %517 = vst.msk [vmem:[%s789_s16 + $0x20] sm:$0xff] %vm512_vm2, %v510_v61 }
 0x1b4 PF: > { %s15_s18 = sadd.s32 1, %s676_s18  }
 0x1b5   : > { %p12_p4 = scmp.ge.s32.totalorder %s15_s18, 4  }
 0x1b7   :  { %14 = sbr.rel (!%p12_p4) target bundleno = 1 (0x1), region = 70 }

// kernel: dense_gcn_forward_pallas.6
= control target key start
LH: loop header
LB: loop body
LE: loop exit
PB: predicated region body
PF: predicated region fallthrough
CT: control target
= control target key end

     0   :  { %s1438_s17 = smov 0   ;;  %s1862_s0 = inlined_call_operand.vmem [shape: f32[96,32], index: 0, kind: input, shape index: {}]   ;;  %s1863_s1 = inlined_call_operand.vmem [shape: f32[96,100], index: 1, kind: input, shape index: {}]   ;;  %s1864_s2 = inlined_call_operand.vmem [shape: f32[32,132], index: 2, kind: input, shape index: {}]   ;;  %s1865_s3 = inlined_call_operand.vmem [shape: f32[100,132], index: 3, kind: input, shape index: {}]   ;;  %s1866_s4 = inlined_call_operand.vmem [shape: f32[48,48], index: 4, kind: input, shape index: {}]   ;;  %s1867_s5 = inlined_call_operand.vmem [shape: f32[48,132], index: 5, kind: input, shape index: {}]   ;;  %s1868_s6 = inlined_call_operand.vmem [shape: f32[48,132], index: 6, kind: input, shape index: {}]   ;;  %s1869_s7 = inlined_call_operand.vmem [shape: f32[132,100], index: 7, kind: input, shape index: {}]   ;;  %s1870_s8 = inlined_call_operand.vmem [shape: f32[48,48], index: 8, kind: input, shape index: {}]   ;;  %s1871_s9 = inlined_call_operand.vmem [shape: f32[48,100], index: 9, kind: input, shape index: {}]   ;;  %s1872_s10 = inlined_call_operand.vmem [shape: f32[48,100], index: 10, kind: input, shape index: {}]   ;;  %s1873_s11 = inlined_call_operand.vmem [shape: f32[96,100], index: 11, kind: output, shape index: {}]  }
   0x1 LB: > { %s1284_s18 = sadd.s32 4294967295, %s1375_s17   ;;  %p1288_p0 = scmp.ge.s32.totalorder %s1375_s17, 1  ;;  %s1375_s17 = sphi %s1438_s17, %s21_s17  }
   0x2   : > { %p349_p1 = scmp.lt.s32.totalorder %s1375_s17, 3 }
   0x4   : > { %p350_p2 = pnand %p1288_p0, %p349_p1 }
   0x5   : > { %s394_s27 = smul.u32 (!%p350_p2), 6, %s1284_s18 }
   0x6   : > { %353 = sbr.rel (%p350_p2) target bundleno = 906 (0x38a), region = 64 }
   0x7   : > { %p395_p3 = scmp.lt.s32.totalorder (!%p350_p2), %s394_s27, 11 }
   0xb   : > { %v457_v0 = vld [vmem:[%s1865_s3 + $0xc8] sm:$0xf]  ;;  %vm477_vm0 = vcmask 1043456   ;;  %v456_v1 = vld [vmem:[%s1865_s3 + $0xc0] sm:$0xf]  ;;  %v455_v2 = vld [vmem:[%s1865_s3 + $0xb8] sm:$0xff] }
   0xc   : > { %1292 = vmatprep.subr.msk.mxu0 %vm477_vm0, %v457_v0  ;;  %v454_v3 = vld [vmem:[%s1865_s3 + $0xb0] sm:$0xff]  ;;  %v453_v4 = vld [vmem:[%s1865_s3 + $0xa8] sm:$0xff]  ;;  %v1377_v5 = vmov 0.0   ;;  %v452_v6 = vld [vmem:[%s1865_s3 + $0xa0] sm:$0xff]  ;;  %s1875_s27 = smov (!%p395_p3, %s394_s27), 11  ;;  %vm585_vm1 = vcmask 261120  }
   0xd   : > { %1293 = vmatpush1.msk.msra.mxu0 %vm477_vm0, %v456_v1  ;;  %668 = vmatprep.mubr.f32.mxu1 %v1377_v5  ;;  %v451_v7 = vld [vmem:[%s1865_s3 + $0x98] sm:$0xff]  ;;  %v450_v8 = vld [vmem:[%s1865_s3 + $0x90] sm:$0xff]  ;;  %v449_v10 = vld [vmem:[%s1865_s3 + $0x88] sm:$0xff]  ;;  %s1492_s12 = sshll.u32 %s1875_s27, 3  ;;  %vm458_vm2 = vcmask 818176   ;;  %vm735_vm3 = vcmask 392192  }
   0xe   : > { %492 = vmatprep.subr.mxu0 %v455_v2  ;;  %548 = vmatprep.mubr.f32.mxu0 %v1377_v5  ;;  %v425_v9 = vld [vmem:[%s1864_s2 + $0x38] sm:$0xff]  ;;  %v424_v11 = vld [vmem:[%s1864_s2 + $0x30] sm:$0xff]  ;;  %v448_v12 = vld [vmem:[%s1865_s3 + $0x80] sm:$0xff]  ;;  %s1504_s20 = scalar_lea.vmem %s1862_s0, %s1492_s12  ;;  %s1565_s22 = scalar_lea.vmem %s1863_s1, %s1492_s12  ;;  %vm932_vm5 = vcmask 31744  }
   0xf   : > { %493 = vmatpush1.msra.mxu0 %v454_v3  ;;  %628 = vmatprep.subr.mxu1 %v425_v9  ;;  %v423_v13 = vld [vmem:[%s1864_s2 + $0x28] sm:$0xff]  ;;  %v422_v14 = vld [vmem:[%s1864_s2 + $0x20] sm:$0xff]  ;;  %v447_v15 = vld [vmem:[%s1865_s3 + $0x78] sm:$0xff]  ;;  %s1827_s28 = scalar_lea.vmem %s1873_s11, %s1492_s12 }
  0x10   : > { %494 = vmatprep.subr.mxu0 %v453_v4  ;;  %629 = vmatpush1.msra.mxu1 %v424_v11  ;;  %v421_v16 = vld [vmem:[%s1864_s2 + $0x18] sm:$0xff]  ;;  %v446_v17 = vld [vmem:[%s1865_s3 + $0x70] sm:$0xff]  ;;  %v419_v19 = vld [vmem:[%s1864_s2 + $0x8] sm:$0xff] }
  0x11   : > { %495 = vmatpush1.msra.mxu0 %v452_v6  ;;  %630 = vmatprep.subr.mxu1 %v423_v13  ;;  %v420_v18 = vld [vmem:[%s1864_s2 + $0x10] sm:$0xff]  ;;  %v445_v20 = vld [vmem:[%s1865_s3 + $0x68] sm:$0xff]  ;;  %v418_v21 = vld [vmem:[%s1864_s2] sm:$0xff] }
  0x12   : > { %496 = vmatprep.subr.mxu0 %v451_v7  ;;  %631 = vmatpush1.msra.mxu1 %v422_v14  ;;  %v444_v22 = vld [vmem:[%s1865_s3 + $0x60] sm:$0xff]  ;;  %v443_v24 = vld [vmem:[%s1865_s3 + $0x58] sm:$0xff]  ;;  %v442_v25 = vld [vmem:[%s1865_s3 + $0x50] sm:$0xff] }
  0x13   : > { %497 = vmatpush1.msra.mxu0 %v450_v8  ;;  %632 = vmatprep.subr.mxu1 %v421_v16  ;;  %v412_v23 = vld [vmem:[%s1504_s20] sm:$0xff]  ;;  %v441_v26 = vld [vmem:[%s1865_s3 + $0x48] sm:$0xff]  ;;  %v439_v29 = vld [vmem:[%s1865_s3 + $0x38] sm:$0xff] }
  0x14   : > { %498 = vmatprep.subr.mxu0 %v449_v10  ;;  %633 = vmatpush1.msra.mxu1 %v420_v18  ;;  %v440_v27 = vld [vmem:[%s1865_s3 + $0x40] sm:$0xff]  ;;  %v413_v28 = vld [vmem:[%s1504_s20 + $0x8] sm:$0xff]  ;;  %v438_v30 = vld [vmem:[%s1865_s3 + $0x30] sm:$0xff] }
  0x15   : > { %499 = vmatpush1.msra.mxu0 %v448_v12  ;;  %634 = vmatprep.subr.mxu1 %v419_v19  ;;  %v437_v31 = vld [vmem:[%s1865_s3 + $0x28] sm:$0xff]  ;;  %v436_v32 = vld [vmem:[%s1865_s3 + $0x20] sm:$0xff]  ;;  %v414_v33 = vld [vmem:[%s1504_s20 + $0x10] sm:$0xff] }
  0x16   : > { %500 = vmatprep.subr.mxu0 %v447_v15  ;;  %635 = vmatpush1.msra.mxu1 %v418_v21  ;;  %v435_v34 = vld [vmem:[%s1865_s3 + $0x18] sm:$0xff]  ;;  %v434_v35 = vld [vmem:[%s1865_s3 + $0x10] sm:$0xff]  ;;  %v433_v36 = vld [vmem:[%s1865_s3 + $0x8] sm:$0xff] }
  0x17   : > { %501 = vmatpush1.msra.mxu0 %v446_v17  ;;  %1300 = vmatmul.mubr.msk.f32.vlgmr.msra.gmra.mxu1 %vm585_vm1, %v412_v23  ;;  %v432_v37 = vld [vmem:[%s1865_s3] sm:$0xff]  ;;  %v415_v38 = vld [vmem:[%s1504_s20 + $0x18] sm:$0xff]  ;;  %v427_v41 = vld [vmem:[%s1565_s22 + $0x8] sm:$0xff] }
  0x18   : > { %502 = vmatprep.subr.mxu0 %v445_v20  ;;  %674 = vmatprep.mubr.f32.mxu1 %v1377_v5  ;;  %v426_v39 = vld [vmem:[%s1565_s22] sm:$0xff]  ;;  %v417_v42 = vld [vmem:[%s1504_s20 + $0x28] sm:$0xff]  ;;  %v428_v43 = vld [vmem:[%s1565_s22 + $0x10] sm:$0xff] }
  0x19   : > { %503 = vmatpush1.msra.mxu0 %v444_v22  ;;  %v416_v40 = vld [vmem:[%s1504_s20 + $0x20] sm:$0xff]  ;;  %v429_v44 = vld [vmem:[%s1565_s22 + $0x18] sm:$0xff]  ;;  %v431_v46 = vld [vmem:[%s1565_s22 + $0x28] sm:$0xff] }
  0x1a   : > { %504 = vmatprep.subr.mxu0 %v443_v24  ;;  %v430_v45 = vld [vmem:[%s1565_s22 + $0x20] sm:$0xff]  ;;  %v930_v47 = vld [vmem:[%s1869_s7 + $0x78] sm:$0xff]  ;;  %v929_v48 = vld [vmem:[%s1869_s7 + $0x70] sm:$0xff] }
  0x1b   : > { %505 = vmatpush1.msra.mxu0 %v442_v25  ;;  %1301 = vmatmul.mubr.msk.f32.gmra.mxu1 %vm585_vm1, %v413_v28  ;;  %v928_v49 = vld [vmem:[%s1869_s7 + $0x68] sm:$0xff]  ;;  %v927_v50 = vld [vmem:[%s1869_s7 + $0x60] sm:$0xff]  ;;  %v926_v51 = vld [vmem:[%s1869_s7 + $0x58] sm:$0xff] }
  0x1c   : > { %506 = vmatprep.subr.mxu0 %v441_v26  ;;  %680 = vmatprep.mubr.f32.mxu1 %v1377_v5  ;;  %v925_v52 = vld [vmem:[%s1869_s7 + $0x50] sm:$0xff]  ;;  %v924_v53 = vld [vmem:[%s1869_s7 + $0x48] sm:$0xff]  ;;  %v923_v54 = vld [vmem:[%s1869_s7 + $0x40] sm:$0xff] }
  0x1d   : > { %507 = vmatpush1.msra.mxu0 %v440_v27  ;;  %v922_v55 = vld [vmem:[%s1869_s7 + $0x38] sm:$0xff]  ;;  %v921_v56 = vld [vmem:[%s1869_s7 + $0x30] sm:$0xff]  ;;  %v920_v57 = vld [vmem:[%s1869_s7 + $0x28] sm:$0xff] }
  0x1e   : > { %508 = vmatprep.subr.mxu0 %v439_v29 }
  0x1f   : > { %509 = vmatpush1.msra.mxu0 %v438_v30  ;;  %1302 = vmatmul.mubr.msk.f32.gmra.mxu1 %vm585_vm1, %v414_v33  ;;  %v707_v33 = vld [vmem:[%s1866_s4 + $0x10] sm:$0xff] }
  0x20   : > { %510 = vmatprep.subr.mxu0 %v437_v31  ;;  %686 = vmatprep.mubr.f32.mxu1 %v1377_v5  ;;  %v705_v31 = vld [vmem:[%s1866_s4] sm:$0xff] }
  0x21   : > { %511 = vmatpush1.msra.mxu0 %v436_v32  ;;  %v706_v32 = vld [vmem:[%s1866_s4 + $0x8] sm:$0xff] }
  0x22   : > { %512 = vmatprep.subr.mxu0 %v435_v34  ;;  %v708_v34 = vld [vmem:[%s1866_s4 + $0x18] sm:$0xff] }
  0x23   : > { %513 = vmatpush1.msra.mxu0 %v434_v35  ;;  %1303 = vmatmul.mubr.msk.f32.gmra.mxu1 %vm585_vm1, %v415_v38  ;;  %v709_v35 = vld [vmem:[%s1866_s4 + $0x20] sm:$0xff]  ;;  %v918_v38 = vld [vmem:[%s1869_s7 + $0x18] sm:$0xff] }
  0x24   : > { %514 = vmatprep.subr.mxu0 %v433_v36  ;;  %692 = vmatprep.mubr.f32.mxu1 %v1377_v5  ;;  %v710_v36 = vld [vmem:[%s1866_s4 + $0x28] sm:$0xff] }
  0x25   : > { %515 = vmatpush1.msra.mxu0 %v432_v37  ;;  %v919_v37 = vld [vmem:[%s1869_s7 + $0x20] sm:$0xff] }
  0x26   : > { %1294 = vmatmul.mubr.msk.f32.vlgmr.msra.gmra.mxu0 %vm458_vm2, %v426_v39  ;;  %954 = vmatprep.subr.mxu0 %v1377_v5  ;;  %v917_v39 = vld [vmem:[%s1869_s7 + $0x10] sm:$0xff] }
  0x27   : > { %554 = vmatprep.mubr.f32.mxu0 %v1377_v5  ;;  %1304 = vmatmul.mubr.msk.f32.gmra.mxu1 %vm585_vm1, %v416_v40  ;;  %v916_v40 = vld [vmem:[%s1869_s7 + $0x8] sm:$0xff] }
  0x28   : > { %698 = vmatprep.mubr.f32.mxu1 %v1377_v5  ;;  %955 = vmatpush1.msra.mxu0 %v930_v47  ;;  %v724_v47 = vld [vmem:[%s1868_s6 + $0x8] sm:$0xff] }
  0x29   : > { %956 = vmatprep.subr.mxu0 %v1377_v5 }
  0x2a   : > { %1295 = vmatmul.mubr.msk.f32.gmra.mxu0 %vm458_vm2, %v427_v41  ;;  %v915_v41 = vld [vmem:[%s1869_s7] sm:$0xff] }
  0x2b   : > { %560 = vmatprep.mubr.f32.mxu0 %v1377_v5  ;;  %1305 = vmatmul.mubr.msk.f32.gmra.mxu1 %vm585_vm1, %v417_v42  ;;  %v931_v42 = vld [vmem:[%s1869_s7 + $0x80] sm:$0xf] }
  0x2c   : > { %818 = vmatprep.mubr.f32.mxu1 %v1377_v5  ;;  %957 = vmatpush1.msra.mxu0 %v929_v48 }
  0x2d   : > { %958 = vmatprep.subr.mxu0 %v1377_v5 }
  0x2e   : > { %1296 = vmatmul.mubr.msk.f32.gmra.mxu0 %vm458_vm2, %v428_v43  ;;  %v711_v43 = vld [vmem:[%s1867_s5] sm:$0xff] }
  0x2f   : > { %566 = vmatprep.mubr.f32.mxu0 %v1377_v5  ;;  %959 = vmatpush1.msra.mxu0 %v928_v49  ;;  %v713_v49 = vld [vmem:[%s1867_s5 + $0x10] sm:$0xff] }
  0x30   : > { %960 = vmatprep.subr.mxu0 %v1377_v5 }
  0x31   : > { %961 = vmatpush1.msra.mxu0 %v927_v50 }
  0x32   : > { %1297 = vmatmul.mubr.msk.f32.gmra.mxu0 %vm458_vm2, %v429_v44  ;;  %962 = vmatprep.subr.mxu0 %v1377_v5  ;;  %v723_v44 = vld [vmem:[%s1868_s6] sm:$0xff] }
  0x33   : > { %572 = vmatprep.mubr.f32.mxu0 %v1377_v5  ;;  %963 = vmatpush1.msra.mxu0 %v926_v51 }
  0x34   : > { %964 = vmatprep.subr.mxu0 %v1377_v5 }
  0x35   : > { %965 = vmatpush1.msra.mxu0 %v925_v52  ;;  %v725_v52 = vld [vmem:[%s1868_s6 + $0x10] sm:$0xff] }
  0x36   : > { %1298 = vmatmul.mubr.msk.f32.gmra.mxu0 %vm458_vm2, %v430_v45  ;;  %966 = vmatprep.subr.mxu0 %v1377_v5 }
  0x37   : > { %578 = vmatprep.mubr.f32.mxu0 %v1377_v5  ;;  %967 = vmatpush1.msra.mxu0 %v924_v53 }
  0x38   : > { %968 = vmatprep.subr.mxu0 %v1377_v5 }
  0x39   : > { %969 = vmatpush1.msra.mxu0 %v923_v54  ;;  %v714_v54 = vld [vmem:[%s1867_s5 + $0x18] sm:$0xff] }
  0x3a   : > { %1299 = vmatmul.mubr.msk.f32.gmra.mxu0 %vm458_vm2, %v431_v46  ;;  %970 = vmatprep.subr.mxu0 %v1377_v5  ;;  %v712_v46 = vld [vmem:[%s1867_s5 + $0x8] sm:$0xff] }
  0x3b   : > { %971 = vmatpush1.msra.mxu0 %v922_v55 }
  0x3c   : > { %972 = vmatprep.subr.mxu0 %v1377_v5 }
  0x3d   : > { %973 = vmatpush1.msra.mxu0 %v921_v56 }
  0x3e   : > { %974 = vmatprep.subr.mxu0 %v1377_v5 }
  0x3f   : > { %975 = vmatpush1.msra.mxu0 %v920_v57 }
  0x40   : > { %976 = vmatprep.subr.mxu0 %v1377_v5 }
  0x41   : > { %977 = vmatpush1.msra.mxu0 %v919_v37 }
  0x42   : > { %978 = vmatprep.subr.mxu0 %v1377_v5 }
  0x43   : > { %979 = vmatpush1.msra.mxu0 %v918_v38  ;;  %v721_v38 = vld [vmem:[%s1867_s5 + $0x50] sm:$0xff] }
  0x44   : > { %980 = vmatprep.subr.mxu0 %v1377_v5 }
  0x45   : > { %981 = vmatpush1.msra.mxu0 %v917_v39 }
  0x46   : > { %982 = vmatprep.subr.mxu0 %v1377_v5 }
  0x47   : > { %983 = vmatpush1.msra.mxu0 %v916_v40 }
  0x48   : > { %984 = vmatprep.subr.mxu0 %v1377_v5 }
  0x49   : > { %985 = vmatpush1.msra.mxu0 %v915_v41 }
  0x4a   : > { %1016 = vmatprep.subr.mxu0 %v1377_v5 }
  0x4b   : > { %1312 = vmatpush2.msk.msra.mxu0 %vm477_vm0, %v931_v42 }
  0xd7   : > { %v670_v58 = vpop.f32.mrf.mxu1 }
  0xd9   : > { %v672_v59 = vpop.f32.mrf.mxu1 }
  0xdb   : > { %v676_v60 = vpop.f32.mrf.mxu1 }
  0xdd   : > { %v678_v61 = vpop.f32.mrf.mxu1 }
  0xdf   : > { %v682_v62 = vpop.f32.mrf.mxu1 }
  0xe1   : > { %v684_v63 = vpop.f32.mrf.mxu1 }
  0xe3   : > { %v688_v2 = vpop.f32.mrf.mxu1 }
  0xe5   : > { %v690_v6 = vpop.f32.mrf.mxu1 }
  0xe6   : > { %v550_v0 = vpop.f32.mrf.mxu0 }
  0xe7   : > { %v694_v9 = vpop.f32.mrf.mxu1  ;;  %v671_v30 = vadd.f32 %v670_v58, %v550_v0  ;;  %v726_v58 = vld [vmem:[%s1868_s6 + $0x18] sm:$0xff]  ;;  %v727_v0 = vld [vmem:[%s1868_s6 + $0x20] sm:$0xff] }
  0xe8   : > { %v552_v1 = vpop.f32.mrf.mxu0 }
  0xe9   : > { %v696_v12 = vpop.f32.mrf.mxu1  ;;  %v673_v29 = vadd.f32 %v672_v59, %v552_v1 }
  0xea   : > { %v556_v3 = vpop.f32.mrf.mxu0 }
  0xeb   : > { %v700_v15 = vpop.f32.mrf.mxu1  ;;  %v677_v28 = vadd.f32 %v676_v60, %v556_v3  ;;  %v715_v60 = vld [vmem:[%s1867_s5 + $0x20] sm:$0xff] }
  0xec   : > { %v558_v4 = vpop.f32.mrf.mxu0 }
  0xed   : > { %v702_v17 = vpop.f32.mrf.mxu1  ;;  %v679_v27 = vadd.f32 %v678_v61, %v558_v4 }
  0xee   : > { %v562_v7 = vpop.f32.mrf.mxu0 }
  0xef   : > { %v683_v26 = vadd.f32 %v682_v62, %v562_v7  ;;  %v728_v7 = vld [vmem:[%s1868_s6 + $0x28] sm:$0xff] }
  0xf0   : > { %v564_v8 = vpop.f32.mrf.mxu0 }
  0xf1   : > { %v685_v25 = vadd.f32 %v684_v63, %v564_v8 }
  0xf2   : > { %v568_v10 = vpop.f32.mrf.mxu0 }
  0xf3   : > { %v689_v24 = vadd.f32 %v688_v2, %v568_v10  ;;  %v716_v2 = vld [vmem:[%s1867_s5 + $0x28] sm:$0xff]  ;;  %v717_v10 = vld [vmem:[%s1867_s5 + $0x30] sm:$0xff] }
  0xf4   : > { %v570_v11 = vpop.f32.mrf.mxu0 }
  0xf5   : > { %v691_v23 = vadd.f32 %v690_v6, %v570_v11 }
  0xf6   : > { %v574_v13 = vpop.f32.mrf.mxu0 }
  0xf7   : > { %v695_v22 = vadd.f32 %v694_v9, %v574_v13 }
  0xf8   : > { %v576_v14 = vpop.f32.mrf.mxu0 }
  0xf9   : > { %v697_v21 = vadd.f32 %v696_v12, %v576_v14 }
  0xfa   : > { %v580_v16 = vpop.f32.mrf.mxu0 }
  0xfb   : > { %v701_v20 = vadd.f32 %v700_v15, %v580_v16  ;;  %v729_v15 = vld [vmem:[%s1868_s6 + $0x30] sm:$0xff] }
  0xfc   : > { %v582_v18 = vpop.f32.mrf.mxu0 }
  0xfd   : > { %v703_v19 = vadd.f32 %v702_v17, %v582_v18  ;;  %v718_v17 = vld [vmem:[%s1867_s5 + $0x38] sm:$0xff] }
  0xff   : > { %774 = vmatprep.subr.mxu1 %v703_v19 }
 0x100   : > { %775 = vmatpush1.msra.mxu1 %v701_v20 }
 0x101   : > { %776 = vmatprep.subr.mxu1 %v697_v21  ;;  %v730_v21 = vld [vmem:[%s1868_s6 + $0x38] sm:$0xff] }
 0x102   : > { %777 = vmatpush1.msra.mxu1 %v695_v22 }
 0x103   : > { %778 = vmatprep.subr.mxu1 %v691_v23 }
 0x104   : > { %779 = vmatpush1.msra.mxu1 %v689_v24  ;;  %v719_v24 = vld [vmem:[%s1867_s5 + $0x40] sm:$0xff] }
 0x105   : > { %780 = vmatprep.subr.mxu1 %v685_v25 }
 0x106   : > { %781 = vmatpush1.msra.mxu1 %v683_v26 }
 0x107   : > { %782 = vmatprep.subr.mxu1 %v679_v27 }
 0x108   : > { %783 = vmatpush1.msra.mxu1 %v677_v28 }
 0x109   : > { %784 = vmatprep.subr.mxu1 %v673_v29  ;;  %v731_v29 = vld [vmem:[%s1868_s6 + $0x40] sm:$0xff] }
 0x10a   : > { %785 = vmatpush1.msra.mxu1 %v671_v30 }
 0x10b   : > { %1306 = vmatmul.mubr.msk.f32.vlgmr.msra.gmra.mxu1 %vm735_vm3, %v705_v31  ;;  %v720_v31 = vld [vmem:[%s1867_s5 + $0x48] sm:$0xff] }
 0x10c   : > { %824 = vmatprep.mubr.f32.mxu1 %v1377_v5 }
 0x10f   : > { %1307 = vmatmul.mubr.msk.f32.gmra.mxu1 %vm735_vm3, %v706_v32 }
 0x110   : > { %830 = vmatprep.mubr.f32.mxu1 %v1377_v5 }
 0x113   : > { %1308 = vmatmul.mubr.msk.f32.gmra.mxu1 %vm735_vm3, %v707_v33 }
 0x114   : > { %836 = vmatprep.mubr.f32.mxu1 %v1377_v5 }
 0x117   : > { %1309 = vmatmul.mubr.msk.f32.gmra.mxu1 %vm735_vm3, %v708_v34 }
 0x118   : > { %842 = vmatprep.mubr.f32.mxu1 %v1377_v5 }
 0x11b   : > { %1310 = vmatmul.mubr.msk.f32.gmra.mxu1 %vm735_vm3, %v709_v35  ;;  %v732_v35 = vld [vmem:[%s1868_s6 + $0x48] sm:$0xff] }
 0x11c   : > { %848 = vmatprep.mubr.f32.mxu1 %v1377_v5 }
 0x11f   : > { %1311 = vmatmul.mubr.msk.f32.gmra.mxu1 %vm735_vm3, %v710_v36 }
 0x1cb   : > { %v820_v45 = vpop.f32.mrf.mxu1 }
 0x1cc   : > { %v855_v5 = vmul.f32 %v820_v45, %v711_v43  ;;  %v733_v43 = vld [vmem:[%s1868_s6 + $0x50] sm:$0xff]  ;;  %v722_v45 = vld [vmem:[%s1867_s5 + $0x58] sm:$0xff] }
 0x1cd   : > { %v822_v48 = vpop.f32.mrf.mxu1 }
 0x1ce   : > { %v867_v50 = vadd.f32 %v855_v5, %v723_v44  ;;  %v856_v51 = vmul.f32 %v822_v48, %v712_v46  ;;  %v734_v48 = vld [vmem:[%s1868_s6 + $0x58] sm:$0xff] }
 0x1cf   : > { %v826_v53 = vpop.f32.mrf.mxu1 }
 0x1d0   : > { %v868_v55 = vadd.f32 %v856_v51, %v724_v47  ;;  %v857_v56 = vmul.f32 %v826_v53, %v713_v49  ;;  %vm879_vm4 = vcmp.gt.f32.partialorder %v867_v50, 0.0  ;;  %v891_v57 = vmul.f32 0.01, %v867_v50 }
 0x1d1   : > { %v828_v59 = vpop.f32.mrf.mxu1 }
 0x1d2   : > { %v892_v61 = vmul.f32 0.01, %v868_v55  ;;  %v869_v62 = vadd.f32 %v857_v56, %v725_v52  ;;  %v858_v63 = vmul.f32 %v828_v59, %v714_v54  ;;  %vm880_vm6 = vcmp.gt.f32.partialorder %v868_v55, 0.0 }
 0x1d3   : > { %v832_v1 = vpop.f32.mrf.mxu1  ;;  %v903_v9 = vsel %vm879_vm4, %v867_v50, %v891_v57 }
 0x1d4   : > { %v870_v3 = vadd.f32 %v858_v63, %v726_v58  ;;  %v859_v4 = vmul.f32 %v832_v1, %v715_v60  ;;  %v904_v6 = vsel %vm880_vm6, %v868_v55, %v892_v61  ;;  %vm881_vm7 = vcmp.gt.f32.partialorder %v869_v62, 0.0 }
 0x1d5   : > { %v834_v8 = vpop.f32.mrf.mxu1  ;;  %1313 = vmatprep.mubr.msk.f32.mxu0 %vm932_vm5, %v904_v6  ;;  %v893_v11 = vmul.f32 0.01, %v869_v62 }
 0x1d6   : > { %v894_v12 = vmul.f32 0.01, %v870_v3  ;;  %v871_v13 = vadd.f32 %v859_v4, %v727_v0  ;;  %v860_v14 = vmul.f32 %v834_v8, %v716_v2  ;;  %1019 = vmatmul.mubr.f32.vlgmr.msra.gmra.mxu0 %v903_v9  ;;  %vm882_vm8 = vcmp.gt.f32.partialorder %v870_v3, 0.0 }
 0x1d7   : > { %v838_v16 = vpop.f32.mrf.mxu1  ;;  %v905_v23 = vsel %vm881_vm7, %v869_v62, %v893_v11  ;;  %v1049_v62 = vld [vmem:[%s1870_s8] sm:$0xff] }
 0x1d8   : > { %v872_v18 = vadd.f32 %v860_v14, %v728_v7  ;;  %v861_v19 = vmul.f32 %v838_v16, %v717_v10  ;;  %v906_v20 = vsel %vm882_vm8, %v870_v3, %v894_v12  ;;  %vm883_vm9 = vcmp.gt.f32.partialorder %v871_v13, 0.0  ;;  %1351 = vmatprep.mubr.msk.f32.mxu1 %vm735_vm3, %v1049_v62  ;;  %v1050_v12 = vld [vmem:[%s1870_s8 + $0x8] sm:$0xff]  ;;  %v1052_v14 = vld [vmem:[%s1870_s8 + $0x18] sm:$0xff] }
 0x1d9   : > { %v840_v22 = vpop.f32.mrf.mxu1  ;;  %1314 = vmatprep.mubr.msk.f32.mxu0 %vm932_vm5, %v906_v20  ;;  %v895_v25 = vmul.f32 0.01, %v871_v13  ;;  %v1054_v16 = vld [vmem:[%s1870_s8 + $0x28] sm:$0xff]  ;;  %v1055_v20 = vld [vmem:[%s1871_s9] sm:$0xff] }
 0x1da   : > { %v896_v26 = vmul.f32 0.01, %v872_v18  ;;  %v873_v27 = vadd.f32 %v861_v19, %v729_v15  ;;  %v862_v28 = vmul.f32 %v840_v22, %v718_v17  ;;  %1024 = vmatmul.mubr.f32.gmra.mxu0 %v905_v23  ;;  %vm884_vm10 = vcmp.gt.f32.partialorder %v872_v18, 0.0  ;;  %v1053_v15 = vld [vmem:[%s1870_s8 + $0x20] sm:$0xff]  ;;  %v1056_v17 = vld [vmem:[%s1871_s9 + $0x8] sm:$0xff] }
 0x1db   : > { %v844_v30 = vpop.f32.mrf.mxu1  ;;  %v907_v37 = vsel %vm883_vm9, %v871_v13, %v895_v25  ;;  %v1051_v13 = vld [vmem:[%s1870_s8 + $0x10] sm:$0xff]  ;;  %v1061_v22 = vld [vmem:[%s1872_s10] sm:$0xff] }
 0x1dc   : > { %v874_v32 = vadd.f32 %v862_v28, %v730_v21  ;;  %v863_v33 = vmul.f32 %v844_v30, %v719_v24  ;;  %v908_v34 = vsel %vm884_vm10, %v872_v18, %v896_v26  ;;  %vm885_vm11 = vcmp.gt.f32.partialorder %v873_v27, 0.0  ;;  %v1062_v18 = vld [vmem:[%s1872_s10 + $0x8] sm:$0xff]  ;;  %v1058_v24 = vld [vmem:[%s1871_s9 + $0x18] sm:$0xff] }
 0x1dd   : > { %v846_v36 = vpop.f32.mrf.mxu1  ;;  %1315 = vmatprep.mubr.msk.f32.mxu0 %vm932_vm5, %v908_v34  ;;  %v897_v39 = vmul.f32 0.01, %v873_v27  ;;  %v1060_v34 = vld [vmem:[%s1871_s9 + $0x28] sm:$0xff] }
 0x1de   : > { %v898_v40 = vmul.f32 0.01, %v874_v32  ;;  %v875_v41 = vadd.f32 %v863_v33, %v731_v29  ;;  %v864_v42 = vmul.f32 %v846_v36, %v720_v31  ;;  %1029 = vmatmul.mubr.f32.gmra.mxu0 %v907_v37  ;;  %vm886_vm12 = vcmp.gt.f32.partialorder %v874_v32, 0.0 }
 0x1df   : > { %v850_v44 = vpop.f32.mrf.mxu1  ;;  %v909_v50 = vsel %vm885_vm11, %v873_v27, %v897_v39  ;;  %v1064_v27 = vld [vmem:[%s1872_s10 + $0x18] sm:$0xff] }
 0x1e0   : > { %v876_v46 = vadd.f32 %v864_v42, %v732_v35  ;;  %v865_v5 = vmul.f32 %v850_v44, %v721_v38  ;;  %v910_v47 = vsel %vm886_vm12, %v874_v32, %v898_v40  ;;  %vm887_vm13 = vcmp.gt.f32.partialorder %v875_v41, 0.0  ;;  %v1057_v32 = vld [vmem:[%s1871_s9 + $0x10] sm:$0xff]  ;;  %v1066_v40 = vld [vmem:[%s1872_s10 + $0x28] sm:$0xff]  ;;  %v1059_v42 = vld [vmem:[%s1871_s9 + $0x20] sm:$0xff] }
 0x1e1   : > { %v852_v49 = vpop.f32.mrf.mxu1  ;;  %1316 = vmatprep.mubr.msk.f32.mxu0 %vm932_vm5, %v910_v47  ;;  %v899_v51 = vmul.f32 0.01, %v875_v41  ;;  %v1063_v38 = vld [vmem:[%s1872_s10 + $0x10] sm:$0xff] }
 0x1e2   : > { %v900_v52 = vmul.f32 0.01, %v876_v46  ;;  %v877_v53 = vadd.f32 %v865_v5, %v733_v43  ;;  %v866_v54 = vmul.f32 %v852_v49, %v722_v45  ;;  %1034 = vmatmul.mubr.f32.gmra.mxu0 %v909_v50  ;;  %vm888_vm14 = vcmp.gt.f32.partialorder %v876_v46, 0.0  ;;  %v1065_v5 = vld [vmem:[%s1872_s10 + $0x20] sm:$0xff] }
 0x1e3   : > { %v911_v57 = vsel %vm887_vm13, %v875_v41, %v899_v51 }
 0x1e4   : > { %v878_v55 = vadd.f32 %v866_v54, %v734_v48  ;;  %v912_v56 = vsel %vm888_vm14, %v876_v46, %v900_v52  ;;  %v901_v58 = vmul.f32 0.01, %v877_v53  ;;  %vm889_vm0 = vcmp.gt.f32.partialorder %v877_v53, 0.0 }
 0x1e5   : > { %1317 = vmatprep.mubr.msk.f32.mxu0 %vm932_vm5, %v912_v56 }
 0x1e6   : > { %v902_v59 = vmul.f32 0.01, %v878_v55  ;;  %1039 = vmatmul.mubr.f32.gmra.mxu0 %v911_v57  ;;  %vm890_vm15 = vcmp.gt.f32.partialorder %v878_v55, 0.0  ;;  %v913_v61 = vsel %vm889_vm0, %v877_v53, %v901_v58 }
 0x1e8   : > { %v914_v60 = vsel %vm890_vm15, %v878_v55, %v902_v59 }
 0x1e9   : > { %1318 = vmatprep.mubr.msk.f32.mxu0 %vm932_vm5, %v914_v60 }
 0x1ea   : > { %1044 = vmatmul.mubr.f32.gmra.mxu0 %v913_v61 }
 0x296   : > { %v1020_v63 = vpop.f32.mrf.mxu0 }
 0x298   : > { %v1022_v0 = vpop.f32.mrf.mxu0 }
 0x29a   : > { %v1025_v1 = vpop.f32.mrf.mxu0 }
 0x29c   : > { %v1027_v2 = vpop.f32.mrf.mxu0 }
 0x29e   : > { %v1030_v3 = vpop.f32.mrf.mxu0 }
 0x2a0   : > { %v1032_v4 = vpop.f32.mrf.mxu0 }
 0x2a2   : > { %v1035_v6 = vpop.f32.mrf.mxu0 }
 0x2a4   : > { %v1037_v7 = vpop.f32.mrf.mxu0 }
 0x2a6   : > { %v1040_v8 = vpop.f32.mrf.mxu0 }
 0x2a8   : > { %v1042_v9 = vpop.f32.mrf.mxu0 }
 0x2aa   : > { %v1045_v10 = vpop.f32.mrf.mxu0 }
 0x2ab   : > { %1339 = vmatprep.subr.mxu1 %v1045_v10 }
 0x2ac   : > { %v1047_v11 = vpop.f32.mrf.mxu0  ;;  %1340 = vmatpush3.msra.mxu1 %v1045_v10 }
 0x2ad   : > { %1341 = vmatprep.subr.mxu1 %v1040_v8 }
 0x2ae   : > { %1342 = vmatpush3.msra.mxu1 %v1040_v8 }
 0x2af   : > { %1343 = vmatprep.subr.mxu1 %v1035_v6 }
 0x2b0   : > { %1344 = vmatpush3.msra.mxu1 %v1035_v6 }
 0x2b1   : > { %1345 = vmatprep.subr.mxu1 %v1030_v3 }
 0x2b2   : > { %1346 = vmatpush3.msra.mxu1 %v1030_v3 }
 0x2b3   : > { %1347 = vmatprep.subr.mxu1 %v1025_v1 }
 0x2b4   : > { %1348 = vmatpush3.msra.mxu1 %v1025_v1 }
 0x2b5   : > { %1349 = vmatprep.subr.mxu1 %v1020_v63 }
 0x2b6   : > { %1350 = vmatpush3.msra.mxu1 %v1020_v63 }
 0x2b7   : > { %1352 = vmatmul.mubr.msk.f32.vlgmr.msra.gmra.mxu1 %vm735_vm3, %v1050_v12 }
 0x2b8   : > { %1354 = vmatprep.mubr.msk.f32.mxu1 %vm735_vm3, %v1051_v13 }
 0x2bb   : > { %1355 = vmatmul.mubr.msk.f32.gmra.mxu1 %vm735_vm3, %v1052_v14 }
 0x2bc   : > { %1357 = vmatprep.mubr.msk.f32.mxu1 %vm735_vm3, %v1053_v15 }
 0x2bf   : > { %1358 = vmatmul.mubr.msk.f32.gmra.mxu1 %vm735_vm3, %v1054_v16 }
 0x377   : > { %v1353_v19 = vpop.f32.mrf.mxu1 }
 0x378   : > { %v1181_v21 = vmul.f32 %v1353_v19, %v1056_v17 }
 0x379   : > { %v1151_v23 = vpop.f32.mrf.mxu1 }
 0x37a   : > { %v1187_v25 = vadd.f32 %v1181_v21, %v1062_v18  ;;  %v1180_v26 = vmul.f32 %v1151_v23, %v1055_v20 }
 0x37b   : > { %v1356_v28 = vpop.f32.mrf.mxu1 }
 0x37c   : > { %vm1193_vm1 = vcmp.gt.f32.partialorder %v1187_v25, 0.0  ;;  %v1199_v29 = vmul.f32 0.01, %v1187_v25  ;;  %v1186_v30 = vadd.f32 %v1180_v26, %v1061_v22  ;;  %v1183_v31 = vmul.f32 %v1356_v28, %v1058_v24 }
 0x37d   : > { %v1161_v33 = vpop.f32.mrf.mxu1 }
 0x37e   : > { %v1205_v35 = vsel %vm1193_vm1, %v1187_v25, %v1199_v29  ;;  %vm1192_vm3 = vcmp.gt.f32.partialorder %v1186_v30, 0.0  ;;  %v1198_v36 = vmul.f32 0.01, %v1186_v30  ;;  %v1189_v37 = vadd.f32 %v1183_v31, %v1064_v27 }
 0x37f   : > { %1211 = vst.msk [vmem:[%s1827_s28 + $0x8] sm:$0xff] %vm458_vm2, %v1205_v35  ;;  %v1182_v39 = vmul.f32 %v1161_v33, %v1057_v32  ;;  %v1359_v41 = vpop.f32.mrf.mxu1 }
 0x380   : > { %v1204_v43 = vsel %vm1192_vm3, %v1186_v30, %v1198_v36  ;;  %vm1195_vm4 = vcmp.gt.f32.partialorder %v1189_v37, 0.0  ;;  %v1201_v44 = vmul.f32 0.01, %v1189_v37  ;;  %v1185_v45 = vmul.f32 %v1359_v41, %v1060_v34 }
 0x381   : > { %1210 = vst.msk [vmem:[%s1827_s28] sm:$0xff] %vm458_vm2, %v1204_v43  ;;  %v1188_v46 = vadd.f32 %v1182_v39, %v1063_v38  ;;  %v1171_v47 = vpop.f32.mrf.mxu1 }
 0x382   : > { %v1207_v48 = vsel %vm1195_vm4, %v1189_v37, %v1201_v44  ;;  %v1191_v49 = vadd.f32 %v1185_v45, %v1066_v40  ;;  %v1184_v50 = vmul.f32 %v1171_v47, %v1059_v42 }
 0x383   : > { %1213 = vst.msk [vmem:[%s1827_s28 + $0x18] sm:$0xff] %vm458_vm2, %v1207_v48  ;;  %vm1194_vm5 = vcmp.gt.f32.partialorder %v1188_v46, 0.0  ;;  %v1200_v51 = vmul.f32 0.01, %v1188_v46 }
 0x384   : > { %vm1197_vm6 = vcmp.gt.f32.partialorder %v1191_v49, 0.0  ;;  %v1203_v52 = vmul.f32 0.01, %v1191_v49  ;;  %v1190_v53 = vadd.f32 %v1184_v50, %v1065_v5 }
 0x385   : > { %v1206_v54 = vsel %vm1194_vm5, %v1188_v46, %v1200_v51 }
 0x386   : > { %1212 = vst.msk [vmem:[%s1827_s28 + $0x10] sm:$0xff] %vm458_vm2, %v1206_v54  ;;  %v1209_v55 = vsel %vm1197_vm6, %v1191_v49, %v1203_v52  ;;  %vm1196_vm7 = vcmp.gt.f32.partialorder %v1190_v53, 0.0  ;;  %v1202_v56 = vmul.f32 0.01, %v1190_v53 }
 0x387   : > { %1215 = vst.msk [vmem:[%s1827_s28 + $0x28] sm:$0xff] %vm458_vm2, %v1209_v55 }
 0x388   : > { %v1208_v57 = vsel %vm1196_vm7, %v1190_v53, %v1202_v56 }
 0x389   : > { %1214 = vst.msk [vmem:[%s1827_s28 + $0x20] sm:$0xff] %vm458_vm2, %v1208_v57 }
 0x38a PF: > { %s21_s17 = sadd.s32 1, %s1375_s17  }
 0x38b   : > { %p18_p4 = scmp.ge.s32.totalorder %s21_s17, 4  }
 0x38d   :  { %20 = sbr.rel (!%p18_p4) target bundleno = 1 (0x1), region = 97 }

// kernel: dense_gcn_forward_pallas.7
= control target key start
LH: loop header
LB: loop body
LE: loop exit
PB: predicated region body
PF: predicated region fallthrough
CT: control target
= control target key end

     0   :  { %s1363_s13 = smov 0   ;;  %s1606_s0 = inlined_call_operand.vmem [shape: f32[96,32], index: 0, kind: input, shape index: {}]   ;;  %s1607_s1 = inlined_call_operand.vmem [shape: f32[96,100], index: 1, kind: input, shape index: {}]   ;;  %s1608_s2 = inlined_call_operand.vmem [shape: f32[96,100], index: 2, kind: input, shape index: {}]   ;;  %s1609_s3 = inlined_call_operand.vmem [shape: f32[32,16], index: 3, kind: input, shape index: {}]   ;;  %s1610_s4 = inlined_call_operand.vmem [shape: f32[100,16], index: 4, kind: input, shape index: {}]   ;;  %s1611_s5 = inlined_call_operand.vmem [shape: f32[100,16], index: 5, kind: input, shape index: {}]   ;;  %s1612_s6 = inlined_call_operand.vmem [shape: f32[48,48], index: 6, kind: input, shape index: {}]   ;;  %s1613_s7 = inlined_call_operand.vmem [shape: f32[48,16], index: 7, kind: input, shape index: {}]   ;;  %s1614_s8 = inlined_call_operand.vmem [shape: f32[48,16], index: 8, kind: input, shape index: {}]   ;;  %s1615_s9 = inlined_call_operand.vmem [shape: f32[96,16], index: 9, kind: input, shape index: {}]   ;;  %s1616_s10 = inlined_call_operand.vmem [shape: f32[96,16], index: 10, kind: output, shape index: {}]  }
   0x1 LB: > { %s1086_s14 = sadd.s32 4294967295, %s1306_s13   ;;  %p1090_p0 = scmp.ge.s32.totalorder %s1306_s13, 1  ;;  %s1306_s13 = sphi %s1363_s13, %s20_s13  }
   0x2   : > { %p346_p1 = scmp.lt.s32.totalorder %s1306_s13, 3 }
   0x4   : > { %p347_p2 = pnand %p1090_p0, %p346_p1 }
   0x5   : > { %s399_s21 = smul.u32 (!%p347_p2), 6, %s1086_s14 }
   0x6   : > { %350 = sbr.rel (%p347_p2) target bundleno = 474 (0x1da), region = 60 }
   0x7   : > { %p400_p3 = scmp.lt.s32.totalorder (!%p347_p2), %s399_s21, 11 }
   0xb   : > { %v457_v0 = vld [vmem:[%s1610_s4 + $0x60] sm:$0xf]  ;;  %vm477_vm0 = vcmask 1043456   ;;  %v438_v1 = vld [vmem:[%s1609_s3 + $0x18] sm:$0xff]  ;;  %v437_v3 = vld [vmem:[%s1609_s3 + $0x10] sm:$0xff]  ;;  %s1618_s21 = smov (!%p400_p3, %s399_s21), 11 }
   0xc   : > { %v456_v2 = vld [vmem:[%s1610_s4 + $0x58] sm:$0xff]  ;;  %1184 = vmatprep.subr.msk.mxu0 %vm477_vm0, %v457_v0  ;;  %1219 = vmatprep.subr.mxu1 %v438_v1  ;;  %v455_v4 = vld [vmem:[%s1610_s4 + $0x50] sm:$0xff]  ;;  %v436_v5 = vld [vmem:[%s1609_s3 + $0x8] sm:$0xff]  ;;  %s1400_s15 = sshll.u32 %s1618_s21, 3  ;;  %vm576_vm1 = vcmask 261120   ;;  %vm458_vm2 = vcmask 818176  }
   0xd   : > { %1185 = vmatpush3.msk.msra.mxu0 %vm477_vm0, %v457_v0  ;;  %1220 = vmatpush3.msra.mxu1 %v438_v1  ;;  %v454_v6 = vld [vmem:[%s1610_s4 + $0x48] sm:$0xff]  ;;  %v435_v7 = vld [vmem:[%s1609_s3] sm:$0xff]  ;;  %s1406_s18 = scalar_lea.vmem %s1606_s0, %s1400_s15  ;;  %v452_v12 = vld [vmem:[%s1610_s4 + $0x38] sm:$0xff]  ;;  %s1464_s16 = scalar_lea.vmem %s1607_s1, %s1400_s15  ;;  %vm849_vm3 = vcmask 392192   ;;  %vm987_vm4 = vcmask 130048  }
   0xe   : > { %1186 = vmatprep.subr.mxu0 %v456_v2  ;;  %1221 = vmatprep.subr.mxu1 %v437_v3  ;;  %v453_v8 = vld [vmem:[%s1610_s4 + $0x40] sm:$0xff]  ;;  %v430_v11 = vld [vmem:[%s1406_s18 + $0x8] sm:$0xff]  ;;  %v707_v13 = vld [vmem:[%s1611_s5 + $0x58] sm:$0xff]  ;;  %s415_s28 = scalar_lea.vmem %s1608_s2, %s1400_s15  ;;  %s1563_s24 = scalar_lea.vmem %s1616_s10, %s1400_s15 }
   0xf   : > { %1187 = vmatpush3.msra.mxu0 %v456_v2  ;;  %1222 = vmatpush3.msra.mxu1 %v437_v3  ;;  %v708_v9 = vld [vmem:[%s1611_s5 + $0x60] sm:$0xf]  ;;  %v451_v14 = vld [vmem:[%s1610_s4 + $0x30] sm:$0xff]  ;;  %v450_v16 = vld [vmem:[%s1610_s4 + $0x28] sm:$0xff] }
  0x10   : > { %1188 = vmatprep.subr.mxu0 %v455_v4  ;;  %1223 = vmatprep.subr.mxu1 %v436_v5  ;;  %v429_v10 = vld [vmem:[%s1406_s18] sm:$0xff]  ;;  %v706_v15 = vld [vmem:[%s1611_s5 + $0x50] sm:$0xff]  ;;  %v705_v17 = vld [vmem:[%s1611_s5 + $0x48] sm:$0xff] }
  0x11   : > { %1189 = vmatpush3.msra.mxu0 %v455_v4  ;;  %1224 = vmatpush3.msra.mxu1 %v436_v5  ;;  %v449_v18 = vld [vmem:[%s1610_s4 + $0x20] sm:$0xff]  ;;  %v448_v20 = vld [vmem:[%s1610_s4 + $0x18] sm:$0xff]  ;;  %v447_v22 = vld [vmem:[%s1610_s4 + $0x10] sm:$0xff] }
  0x12   : > { %1190 = vmatprep.subr.mxu0 %v454_v6  ;;  %1225 = vmatprep.subr.mxu1 %v435_v7  ;;  %v704_v19 = vld [vmem:[%s1611_s5 + $0x40] sm:$0xff]  ;;  %v703_v21 = vld [vmem:[%s1611_s5 + $0x38] sm:$0xff]  ;;  %v702_v23 = vld [vmem:[%s1611_s5 + $0x30] sm:$0xff] }
  0x13   : > { %1191 = vmatpush3.msra.mxu0 %v454_v6  ;;  %1226 = vmatpush3.msra.mxu1 %v435_v7  ;;  %v446_v24 = vld [vmem:[%s1610_s4 + $0x8] sm:$0xff]  ;;  %v431_v26 = vld [vmem:[%s1406_s18 + $0x10] sm:$0xff]  ;;  %v445_v27 = vld [vmem:[%s1610_s4] sm:$0xff] }
  0x14   : > { %1192 = vmatprep.subr.mxu0 %v453_v8  ;;  %1227 = vmatprep.mubr.msk.f32.mxu1 %vm576_vm1, %v429_v10  ;;  %v701_v25 = vld [vmem:[%s1611_s5 + $0x28] sm:$0xff]  ;;  %v432_v28 = vld [vmem:[%s1406_s18 + $0x18] sm:$0xff]  ;;  %v700_v29 = vld [vmem:[%s1611_s5 + $0x20] sm:$0xff] }
  0x15   : > { %1236 = vmatprep.subr.msk.mxu1 %vm477_vm0, %v708_v9  ;;  %1193 = vmatpush3.msra.mxu0 %v453_v8  ;;  %v439_v30 = vld [vmem:[%s1464_s16] sm:$0xff]  ;;  %v440_v31 = vld [vmem:[%s1464_s16 + $0x8] sm:$0xff]  ;;  %v699_v32 = vld [vmem:[%s1611_s5 + $0x18] sm:$0xff] }
  0x16   : > { %1228 = vmatmul.mubr.msk.f32.vlgmr.msra.gmra.mxu1 %vm576_vm1, %v430_v11  ;;  %1194 = vmatprep.subr.mxu0 %v452_v12  ;;  %v433_v33 = vld [vmem:[%s1406_s18 + $0x20] sm:$0xff]  ;;  %v441_v34 = vld [vmem:[%s1464_s16 + $0x10] sm:$0xff]  ;;  %v434_v35 = vld [vmem:[%s1406_s18 + $0x28] sm:$0xff]  ;;  %s1544_s18 = scalar_lea.vmem %s1615_s9, %s1400_s15 }
  0x17   : > { %1237 = vmatpush3.msk.msra.mxu1 %vm477_vm0, %v708_v9  ;;  %1195 = vmatpush3.msra.mxu0 %v452_v12  ;;  %v698_v36 = vld [vmem:[%s1611_s5 + $0x10] sm:$0xff]  ;;  %v442_v37 = vld [vmem:[%s1464_s16 + $0x18] sm:$0xff]  ;;  %v697_v38 = vld [vmem:[%s1611_s5 + $0x8] sm:$0xff] }
  0x18   : > { %1238 = vmatprep.subr.mxu1 %v707_v13  ;;  %1196 = vmatprep.subr.mxu0 %v451_v14  ;;  %v443_v39 = vld [vmem:[%s1464_s16 + $0x20] sm:$0xff]  ;;  %v444_v42 = vld [vmem:[%s1464_s16 + $0x28] sm:$0xff]  ;;  %v692_v44 = vld [vmem:[%s415_s28 + $0x10] sm:$0xff] }
  0x19   : > { %1239 = vmatpush3.msra.mxu1 %v707_v13  ;;  %1197 = vmatpush3.msra.mxu0 %v451_v14  ;;  %v690_v40 = vld [vmem:[%s415_s28] sm:$0xff]  ;;  %v691_v43 = vld [vmem:[%s415_s28 + $0x8] sm:$0xff]  ;;  %v693_v45 = vld [vmem:[%s415_s28 + $0x18] sm:$0xff] }
  0x1a   : > { %1240 = vmatprep.subr.mxu1 %v706_v15  ;;  %1198 = vmatprep.subr.mxu0 %v450_v16  ;;  %v696_v41 = vld [vmem:[%s1611_s5] sm:$0xff]  ;;  %v695_v47 = vld [vmem:[%s415_s28 + $0x28] sm:$0xff] }
  0x1b   : > { %1241 = vmatpush3.msra.mxu1 %v706_v15  ;;  %1199 = vmatpush3.msra.mxu0 %v450_v16  ;;  %v694_v46 = vld [vmem:[%s415_s28 + $0x20] sm:$0xff]  ;;  %v832_v15 = vld [vmem:[%s1612_s6 + $0x8] sm:$0xff]  ;;  %v833_v16 = vld [vmem:[%s1612_s6 + $0x10] sm:$0xff] }
  0x1c   : > { %1242 = vmatprep.subr.mxu1 %v705_v17  ;;  %1200 = vmatprep.subr.mxu0 %v449_v18  ;;  %v831_v48 = vld [vmem:[%s1612_s6] sm:$0xff] }
  0x1d   : > { %1243 = vmatpush3.msra.mxu1 %v705_v17  ;;  %1201 = vmatpush3.msra.mxu0 %v449_v18  ;;  %v834_v17 = vld [vmem:[%s1612_s6 + $0x18] sm:$0xff]  ;;  %v835_v18 = vld [vmem:[%s1612_s6 + $0x20] sm:$0xff] }
  0x1e   : > { %1244 = vmatprep.subr.mxu1 %v704_v19  ;;  %1202 = vmatprep.subr.mxu0 %v448_v20 }
  0x1f   : > { %1245 = vmatpush3.msra.mxu1 %v704_v19  ;;  %1203 = vmatpush3.msra.mxu0 %v448_v20  ;;  %v836_v19 = vld [vmem:[%s1612_s6 + $0x28] sm:$0xff] }
  0x20   : > { %1246 = vmatprep.subr.mxu1 %v703_v21  ;;  %1204 = vmatprep.subr.mxu0 %v447_v22  ;;  %v838_v20 = vld [vmem:[%s1613_s7 + $0x8] sm:$0xff] }
  0x21   : > { %1247 = vmatpush3.msra.mxu1 %v703_v21  ;;  %1205 = vmatpush3.msra.mxu0 %v447_v22  ;;  %v844_v21 = vld [vmem:[%s1614_s8 + $0x8] sm:$0xff] }
  0x22   : > { %1248 = vmatprep.subr.mxu1 %v702_v23  ;;  %1206 = vmatprep.subr.mxu0 %v446_v24 }
  0x23   : > { %1249 = vmatpush3.msra.mxu1 %v702_v23  ;;  %1207 = vmatpush3.msra.mxu0 %v446_v24  ;;  %v837_v23 = vld [vmem:[%s1613_s7] sm:$0xff] }
  0x24   : > { %1250 = vmatprep.subr.mxu1 %v701_v25  ;;  %1230 = vmatprep.mubr.msk.f32.mxu1 %vm576_vm1, %v431_v26  ;;  %v843_v26 = vld [vmem:[%s1614_s8] sm:$0xff] }
  0x25   : > { %1251 = vmatpush3.msra.mxu1 %v701_v25  ;;  %1208 = vmatprep.subr.mxu0 %v445_v27  ;;  %v976_v25 = vld [vmem:[%s1544_s18 + $0x8] sm:$0xff] }
  0x26   : > { %1231 = vmatmul.mubr.msk.f32.gmra.mxu1 %vm576_vm1, %v432_v28  ;;  %1252 = vmatprep.subr.mxu1 %v700_v29  ;;  %v840_v28 = vld [vmem:[%s1613_s7 + $0x18] sm:$0xff] }
  0x27   : > { %1209 = vmatpush3.msra.mxu0 %v445_v27  ;;  %1210 = vmatprep.mubr.msk.f32.mxu0 %vm458_vm2, %v439_v30 }
  0x28   : > { %1253 = vmatpush3.msra.mxu1 %v700_v29  ;;  %1211 = vmatmul.mubr.msk.f32.vlgmr.msra.gmra.mxu0 %vm458_vm2, %v440_v31  ;;  %v975_v31 = vld [vmem:[%s1544_s18] sm:$0xff] }
  0x29   : > { %1254 = vmatprep.subr.mxu1 %v699_v32  ;;  %1233 = vmatprep.mubr.msk.f32.mxu1 %vm576_vm1, %v433_v33 }
  0x2a   : > { %1255 = vmatpush3.msra.mxu1 %v699_v32  ;;  %1213 = vmatprep.mubr.msk.f32.mxu0 %vm458_vm2, %v441_v34  ;;  %v846_v32 = vld [vmem:[%s1614_s8 + $0x18] sm:$0xff]  ;;  %v839_v34 = vld [vmem:[%s1613_s7 + $0x10] sm:$0xff] }
  0x2b   : > { %1234 = vmatmul.mubr.msk.f32.gmra.mxu1 %vm576_vm1, %v434_v35  ;;  %1256 = vmatprep.subr.mxu1 %v698_v36 }
  0x2c   : > { %1257 = vmatpush3.msra.mxu1 %v698_v36  ;;  %1214 = vmatmul.mubr.msk.f32.gmra.mxu0 %vm458_vm2, %v442_v37 }
  0x2d   : > { %1258 = vmatprep.subr.mxu1 %v697_v38  ;;  %1216 = vmatprep.mubr.msk.f32.mxu0 %vm458_vm2, %v443_v39  ;;  %v845_v39 = vld [vmem:[%s1614_s8 + $0x10] sm:$0xff] }
  0x2e   : > { %1259 = vmatpush3.msra.mxu1 %v697_v38  ;;  %1262 = vmatprep.mubr.msk.f32.mxu1 %vm458_vm2, %v690_v40  ;;  %v978_v38 = vld [vmem:[%s1544_s18 + $0x18] sm:$0xff] }
  0x2f   : > { %1260 = vmatprep.subr.mxu1 %v696_v41 }
  0x30   : > { %1261 = vmatpush3.msra.mxu1 %v696_v41  ;;  %1217 = vmatmul.mubr.msk.f32.gmra.mxu0 %vm458_vm2, %v444_v42  ;;  %v842_v41 = vld [vmem:[%s1613_s7 + $0x28] sm:$0xff] }
  0x31   : > { %1263 = vmatmul.mubr.msk.f32.vlgmr.msra.gmra.mxu1 %vm458_vm2, %v691_v43  ;;  %1283 = vmatprep.mubr.msk.f32.mxu0 %vm849_vm3, %v831_v48  ;;  %v841_v48 = vld [vmem:[%s1613_s7 + $0x20] sm:$0xff] }
  0x32   : > { %1265 = vmatprep.mubr.msk.f32.mxu1 %vm458_vm2, %v692_v44 }
  0x35   : > { %1266 = vmatmul.mubr.msk.f32.gmra.mxu1 %vm458_vm2, %v693_v45  ;;  %v977_v45 = vld [vmem:[%s1544_s18 + $0x10] sm:$0xff] }
  0x36   : > { %1268 = vmatprep.mubr.msk.f32.mxu1 %vm458_vm2, %v694_v46  ;;  %v848_v46 = vld [vmem:[%s1614_s8 + $0x28] sm:$0xff] }
  0x39   : > { %1269 = vmatmul.mubr.msk.f32.gmra.mxu1 %vm458_vm2, %v695_v47 }
  0xd6   : > { %v1229_v49 = vpop.f32.mrf.mxu1 }
  0xd8   : > { %v661_v50 = vpop.f32.mrf.mxu1 }
  0xe6   : > { %v1232_v51 = vpop.f32.mrf.mxu1 }
  0xe8   : > { %v1212_v52 = vpop.f32.mrf.mxu0  ;;  %v671_v53 = vpop.f32.mrf.mxu1 }
  0xe9   : > { %v667_v10 = vadd.f32 %v1229_v49, %v1212_v52  ;;  %v980_v52 = vld [vmem:[%s1544_s18 + $0x28] sm:$0xff] }
  0xea   : > { %v547_v54 = vpop.f32.mrf.mxu0 }
  0xeb   : > { %v1235_v55 = vpop.f32.mrf.mxu1  ;;  %v662_v12 = vadd.f32 %v661_v50, %v547_v54 }
  0xec   : > { %v1215_v56 = vpop.f32.mrf.mxu0 }
  0xed   : > { %v681_v57 = vpop.f32.mrf.mxu1  ;;  %v677_v6 = vadd.f32 %v1232_v51, %v1215_v56 }
  0xee   : > { %v557_v58 = vpop.f32.mrf.mxu0 }
  0xef   : > { %v672_v8 = vadd.f32 %v671_v53, %v557_v58  ;;  %v847_v53 = vld [vmem:[%s1614_s8 + $0x20] sm:$0xff] }
  0xf0   : > { %v1218_v60 = vpop.f32.mrf.mxu0  ;;  %v979_v58 = vld [vmem:[%s1544_s18 + $0x20] sm:$0xff] }
  0xf1   : > { %v1264_v59 = vpop.f32.mrf.mxu1  ;;  %v687_v1 = vadd.f32 %v1235_v55, %v1218_v60 }
  0xf2   : > { %v567_v63 = vpop.f32.mrf.mxu0  ;;  %v826_v13 = vadd.f32 %v1264_v59, %v667_v10 }
  0xf3   : > { %v796_v61 = vpop.f32.mrf.mxu1  ;;  %v682_v3 = vadd.f32 %v681_v57, %v567_v63 }
  0xf4   : > { %v825_v14 = vadd.f32 %v796_v61, %v662_v12 }
  0xf5   : > { %v1267_v62 = vpop.f32.mrf.mxu1 }
  0xf6   : > { %v828_v9 = vadd.f32 %v1267_v62, %v677_v6 }
  0xf7   : > { %v806_v0 = vpop.f32.mrf.mxu1 }
  0xf8   : > { %v827_v11 = vadd.f32 %v806_v0, %v672_v8 }
  0xf9   : > { %v1270_v2 = vpop.f32.mrf.mxu1 }
  0xfa   : > { %v830_v4 = vadd.f32 %v1270_v2, %v687_v1 }
  0xfb   : > { %v816_v5 = vpop.f32.mrf.mxu1 }
  0xfc   : > { %v829_v7 = vadd.f32 %v816_v5, %v682_v3  ;;  %1271 = vmatprep.subr.mxu0 %v830_v4 }
  0xfd   : > { %1272 = vmatpush3.msra.mxu0 %v830_v4 }
  0xfe   : > { %1273 = vmatprep.subr.mxu0 %v829_v7 }
  0xff   : > { %1274 = vmatpush3.msra.mxu0 %v829_v7 }
 0x100   : > { %1275 = vmatprep.subr.mxu0 %v828_v9 }
 0x101   : > { %1276 = vmatpush3.msra.mxu0 %v828_v9 }
 0x102   : > { %1277 = vmatprep.subr.mxu0 %v827_v11 }
 0x103   : > { %1278 = vmatpush3.msra.mxu0 %v827_v11 }
 0x104   : > { %1279 = vmatprep.subr.mxu0 %v826_v13 }
 0x105   : > { %1280 = vmatpush3.msra.mxu0 %v826_v13 }
 0x106   : > { %1281 = vmatprep.subr.mxu0 %v825_v14 }
 0x107   : > { %1282 = vmatpush3.msra.mxu0 %v825_v14 }
 0x108   : > { %1284 = vmatmul.mubr.msk.f32.vlgmr.msra.gmra.mxu0 %vm849_vm3, %v832_v15 }
 0x109   : > { %1286 = vmatprep.mubr.msk.f32.mxu0 %vm849_vm3, %v833_v16 }
 0x10c   : > { %1287 = vmatmul.mubr.msk.f32.gmra.mxu0 %vm849_vm3, %v834_v17 }
 0x10d   : > { %1289 = vmatprep.mubr.msk.f32.mxu0 %vm849_vm3, %v835_v18 }
 0x110   : > { %1290 = vmatmul.mubr.msk.f32.gmra.mxu0 %vm849_vm3, %v836_v19 }
 0x1c8   : > { %v1285_v22 = vpop.f32.mrf.mxu0 }
 0x1c9   : > { %v964_v24 = vmul.f32 %v1285_v22, %v838_v20 }
 0x1ca   : > { %v934_v27 = vpop.f32.mrf.mxu0 }
 0x1cb   : > { %v970_v29 = vadd.f32 %v964_v24, %v844_v21  ;;  %v963_v30 = vmul.f32 %v934_v27, %v837_v23 }
 0x1cc   : > { %v1288_v33 = vpop.f32.mrf.mxu0 }
 0x1cd   : > { %v982_v35 = vadd.f32 %v976_v25, %v970_v29  ;;  %v969_v36 = vadd.f32 %v963_v30, %v843_v26  ;;  %v966_v37 = vmul.f32 %v1288_v33, %v840_v28 }
 0x1ce   : > { %v944_v40 = vpop.f32.mrf.mxu0 }
 0x1cf   : > { %989 = vst.msk [vmem:[%s1563_s24 + $0x8] sm:$0xff] %vm987_vm4, %v982_v35  ;;  %v981_v42 = vadd.f32 %v975_v31, %v969_v36  ;;  %v972_v43 = vadd.f32 %v966_v37, %v846_v32  ;;  %v965_v44 = vmul.f32 %v944_v40, %v839_v34 }
 0x1d0   : > { %v1291_v47 = vpop.f32.mrf.mxu0 }
 0x1d1   : > { %988 = vst.msk [vmem:[%s1563_s24] sm:$0xff] %vm987_vm4, %v981_v42  ;;  %v984_v49 = vadd.f32 %v978_v38, %v972_v43  ;;  %v971_v50 = vadd.f32 %v965_v44, %v845_v39  ;;  %v968_v51 = vmul.f32 %v1291_v47, %v842_v41 }
 0x1d2   : > { %v954_v54 = vpop.f32.mrf.mxu0 }
 0x1d3   : > { %991 = vst.msk [vmem:[%s1563_s24 + $0x18] sm:$0xff] %vm987_vm4, %v984_v49  ;;  %v983_v55 = vadd.f32 %v977_v45, %v971_v50  ;;  %v974_v56 = vadd.f32 %v968_v51, %v848_v46  ;;  %v967_v57 = vmul.f32 %v954_v54, %v841_v48 }
 0x1d5   : > { %990 = vst.msk [vmem:[%s1563_s24 + $0x10] sm:$0xff] %vm987_vm4, %v983_v55  ;;  %v986_v59 = vadd.f32 %v980_v52, %v974_v56  ;;  %v973_v60 = vadd.f32 %v967_v57, %v847_v53 }
 0x1d7   : > { %993 = vst.msk [vmem:[%s1563_s24 + $0x28] sm:$0xff] %vm987_vm4, %v986_v59  ;;  %v985_v61 = vadd.f32 %v979_v58, %v973_v60 }
 0x1d9   : > { %992 = vst.msk [vmem:[%s1563_s24 + $0x20] sm:$0xff] %vm987_vm4, %v985_v61 }
 0x1da PF: > { %s20_s13 = sadd.s32 1, %s1306_s13  }
 0x1db   : > { %p17_p4 = scmp.ge.s32.totalorder %s20_s13, 4  }
 0x1dd   :  { %19 = sbr.rel (!%p17_p4) target bundleno = 1 (0x1), region = 99 }

</bundles_post_ra>
